<compile_context>
chip_gen: v6e
topology: v6e:2x2x1
jax: 0.10.0
libtpu: 0.0.40
codegen_flags: <defaults>
</compile_context>

<pallas_src>
import functools
import sys

import jax
import jax.numpy as jnp
from jax import lax
from jax.experimental import pallas as pl
from jax.experimental.pallas import tpu as pltpu


_INV_SQRT2 = 0.7071067811865476  # 1/sqrt(2), hoisted Python constant


def _round_up(x: int, m: int) -> int:
    return ((x + m - 1) // m) * m


def _n_sub_for(tm: int) -> int:
    # 2-4 row sub-blocks of >=128 rows so GELU overlaps the MXU; 1 for tiny tiles.
    return max(1, min(4, tm // 128))


def _vmem_capacity_bytes() -> int:
    # Hardware query; conservative 64 MiB default if the query is unavailable.
    try:
        return int(pltpu.get_tpu_info().vmem_capacity_bytes)
    except Exception:  # pragma: no cover - non-TPU / very old builds only
        return 64 * 1024 * 1024


def _plan_tiles(M, Din, Dh, Dout, x_itemsize, w_itemsize, out_itemsize):
    """Pick (tm, tk, n_sub, vmem_limit) from an explicit VMEM byte plan."""
    vmem_cap = _vmem_capacity_bytes()
    budget = (vmem_cap * 3) // 4           # 48 MiB on 64 MiB chips, 96 MiB on 128 MiB
    max_tm = 1024 if vmem_cap >= 96 * 1024 * 1024 else 512

    m_ceiling = _round_up(max(M, 1), 16)   # sublane-friendly for f32 and bf16
    tm_cands = sorted({min(c, m_ceiling)
                       for c in (1024, 512, 256, 128, 64, 32, 16) if c <= max_tm},
                      reverse=True)

    # Dh tile candidates: exact divisors of Dh that are multiples of 128 (so the
    # reduction axis is never ragged and weight blocks stay lane-aligned).
    tk_cands = [Dh]
    t = Dh
    while t % 2 == 0 and (t // 2) >= 128 and (t // 2) % 128 == 0:
        t //= 2
        tk_cands.append(t)

    def plan_bytes(tm, tk):
        # Conservative: weights counted double-buffered even when Buffered(1)
        # succeeds; h intermediate counted for the whole row tile.
        x_b = 2 * tm * Din * x_itemsize
        o_b = 2 * tm * Dout * out_itemsize
        w_b = 2 * (Din * tk + tk + tk * Dout + Dout) * w_itemsize
        acc_b = tm * Dout * 4
        h_b = tm * tk * (4 + w_itemsize)   # f32 h + cast copy before fc2
        return x_b + o_b + w_b + acc_b + h_b

    for tk in tk_cands:         # prefer fully-resident weights (fetched once) ...
        for tm in tm_cands:     # ... then the tallest row tile that fits.
            if plan_bytes(tm, tk) <= budget:
                return tm, tk, _n_sub_for(tm), budget
    tm, tk = tm_cands[-1], tk_cands[-1]    # best effort for very large models
    return tm, tk, _n_sub_for(tm), budget


def _mlp_kernel(x_ref, w1_ref, b1_ref, w2_ref, b2_ref, o_ref, acc_ref,
                *, n_sub, tm_sub):
    # x_ref: (tm, Din); w1_ref: (Din, tk); b1_ref: (1, tk);
    # w2_ref: (tk, Dout); b2_ref: (1, Dout); o_ref: (tm, Dout);
    # acc_ref: (tm, Dout) f32 accumulator across the Dh grid axis.
    k = pl.program_id(1)

    @pl.when(k == 0)
    def _():
        acc_ref[...] = jnp.zeros_like(acc_ref)

    b1f = b1_ref[...].astype(jnp.float32)      # hoisted bias load/cast
    w2_dtype = w2_ref.dtype

    # Statically unrolled row sub-blocks: the GELU (VPU/EUP) of sub-block j can
    # be scheduled under the MXU matmuls of neighbouring sub-blocks.
    for j in range(n_sub):
        r0 = j * tm_sub                        # static, tm_sub-aligned offset
        xb = x_ref[pl.ds(r0, tm_sub), :]
        # fc1 -- MXU consumes the native dtype, accumulates in f32.
        h = jnp.dot(xb, w1_ref[...], preferred_element_type=jnp.float32)
        h = h + b1f
        # Exact (erf) GELU in f32 -- matches torch.nn.GELU() default.
        h = 0.5 * h * (1.0 + lax.erf(h * _INV_SQRT2))
        # drop1 / drop2: p = 0.0 -> identity (omitted).
        # fc2 -- cast activations to the weight dtype for the MXU.
        # TODO(synk): confirm in the bundle dump that this cast fuses into the
        # GELU epilogue rather than materializing a second tm_sub x tk pass.
        acc_ref[pl.ds(r0, tm_sub), :] += jnp.dot(
            h.astype(w2_dtype), w2_ref[...], preferred_element_type=jnp.float32)

    @pl.when(k == pl.num_programs(1) - 1)
    def _():
        y = acc_ref[...] + b2_ref[...].astype(jnp.float32)
        o_ref[...] = y.astype(o_ref.dtype)


@functools.partial(jax.jit,
                   static_argnames=("tm", "tk", "n_sub", "vmem_limit",
                                    "single_buffer_weights"))
def _mlp_pallas_2d(x2, w1, b1_2, w2, b2_2, *, tm, tk, n_sub, vmem_limit,
                   single_buffer_weights):
    M, Din = x2.shape
    Dh = w1.shape[1]
    Dout = w2.shape[1]
    assert Dh % tk == 0 and tm % n_sub == 0

    n_m = pl.cdiv(M, tm)
    n_k = Dh // tk
    grid = (n_m, n_k)

    # Weights/biases are single-buffered only when resident (constant index map);
    # streamed tiles keep the default double buffering.
    wkw = ({"pipeline_mode": pl.Buffered(1)}
           if (single_buffer_weights and n_k == 1) else {})

    w_bytes = (Din * Dh + Dh + Dh * Dout + Dout) * w1.dtype.itemsize
    cost = pl.CostEstimate(
        flops=2 * M * (Din * Dh + Dh * Dout),
        transcendentals=M * Dh,                  # erf in the GELU
        bytes_accessed=M * Din * x2.dtype.itemsize
        + M * Dout * x2.dtype.itemsize
        + w_bytes * (1 if n_k == 1 else n_m),    # streamed weights re-read per row tile
    )

    kernel = functools.partial(_mlp_kernel, n_sub=n_sub, tm_sub=tm // n_sub)

    return pl.pallas_call(
        kernel,
        out_shape=jax.ShapeDtypeStruct((M, Dout), x2.dtype),
        grid_spec=pltpu.PrefetchScalarGridSpec(
            num_scalar_prefetch=0,
            grid=grid,
            in_specs=[
                pl.BlockSpec((tm, Din), lambda i, k: (i, 0)),
                pl.BlockSpec((Din, tk), lambda i, k: (0, k), **wkw),
                pl.BlockSpec((1, tk), lambda i, k: (0, k), **wkw),
                pl.BlockSpec((tk, Dout), lambda i, k: (k, 0), **wkw),
                pl.BlockSpec((1, Dout), lambda i, k: (0, 0), **wkw),
            ],
            out_specs=pl.BlockSpec((tm, Dout), lambda i, k: (i, 0)),
            scratch_shapes=[pltpu.VMEM((tm, Dout), jnp.float32)],
        ),
        compiler_params=pltpu.CompilerParams(
            dimension_semantics=("parallel", "arbitrary"),
            vmem_limit_bytes=vmem_limit,
        ),
        cost_estimate=cost,
    )(x2, w1, b1_2, w2, b2_2)


def mlp_pallas(x, w1, b1, w2, b2):
    """Fused MLP: GELU(x @ w1 + b1) @ w2 + b2 (dropout p=0.0 omitted).

    x: (B, N, Din); w1: (Din, Dh); b1: (Dh,); w2: (Dh, Dout); b2: (Dout,).
    Weights are stored transposed w.r.t. torch.nn.Linear (here (in, out)).
    For peak MXU throughput (especially on v5e) pass bf16 weights/activations;
    the kernel always accumulates in f32.
    """
    B, N, Din = x.shape
    Dh = w1.shape[1]
    Dout = w2.shape[1]
    M = B * N

    tm, tk, n_sub, vmem_limit = _plan_tiles(
        M, Din, Dh, Dout, x.dtype.itemsize, w1.dtype.itemsize, x.dtype.itemsize)

    x2 = x.reshape(M, Din)        # no host-side pad: a ragged last row tile is
    b1_2 = b1.reshape(1, Dh)      # handled by Pallas partial-tile masking.
    b2_2 = b2.reshape(1, Dout)

    single_buffer = tk == Dh
    try:
        out2 = _mlp_pallas_2d(x2, w1, b1_2, w2, b2_2, tm=tm, tk=tk, n_sub=n_sub,
                              vmem_limit=vmem_limit,
                              single_buffer_weights=single_buffer)
    except Exception as e:  # noqa: BLE001
        if not single_buffer:
            raise
        # Narrow, logged fallback: only the Buffered(1) request differs between
        # the two plans, and the VMEM plan already budgets double-buffered
        # weights, so the retry cannot silently exceed the limit.
        print("mlp_pallas: single-buffered weights (pl.Buffered(1)) rejected "
              f"({type(e).__name__}); retrying with default double buffering.",
              file=sys.stderr)
        out2 = _mlp_pallas_2d(x2, w1, b1_2, w2, b2_2, tm=tm, tk=tk, n_sub=n_sub,
                              vmem_limit=vmem_limit, single_buffer_weights=False)

    return out2.reshape(B, N, Dout)


def _reference_mlp(x, w1, b1, w2, b2):
    h = jnp.einsum("bnd,dh->bnh", x, w1, precision=lax.Precision.HIGHEST) + b1
    h = jax.nn.gelu(h, approximate=False)
    return jnp.einsum("bnh,ho->bno", h, w2, precision=lax.Precision.HIGHEST) + b2


if __name__ == "__main__":
    # Small ViT-style MLP: tokens = B*N = 16, embed dim 128, hidden = 4x = 512.
    # (Lane-dense 128-multiples keep the store path unmasked.)
    B, N = 2, 8
    Din, Dh, Dout = 128, 512, 128

    key = jax.random.PRNGKey(0)
    kx, k1, k2, k3, k4 = jax.random.split(key, 5)

    x = jax.random.normal(kx, (B, N, Din), dtype=jnp.float32)
    # torch.nn.Linear stores (out, in); we pass the transposed (in, out) form.
    w1 = jax.random.normal(k1, (Din, Dh), dtype=jnp.float32) * 0.05
    b1 = jax.random.normal(k2, (Dh,), dtype=jnp.float32) * 0.05
    w2 = jax.random.normal(k3, (Dh, Dout), dtype=jnp.float32) * 0.05
    b2 = jax.random.normal(k4, (Dout,), dtype=jnp.float32) * 0.05

    out = mlp_pallas(x, w1, b1, w2, b2)
    out = jax.block_until_ready(out)

    ref = _reference_mlp(x, w1, b1, w2, b2)
    assert out.shape == (B, N, Dout)
    assert jnp.allclose(out, ref, atol=1e-4, rtol=1e-4), "mismatch vs reference"

    print("KERNEL_OK")
</pallas_src>

<mosaic_0001>
module attributes {stable_mosaic.version = 11 : i64} {
  func.func @_mlp_kernel(%arg0: i32, %arg1: i32, %arg2: memref<16x128xf32, #tpu.memory_space<vmem>>, %arg3: memref<128x512xf32, #tpu.memory_space<vmem>>, %arg4: memref<1x512xf32, #tpu.memory_space<vmem>>, %arg5: memref<512x128xf32, #tpu.memory_space<vmem>>, %arg6: memref<1x128xf32, #tpu.memory_space<vmem>>, %arg7: memref<16x128xf32, #tpu.memory_space<vmem>>, %arg8: memref<16x128xf32, #tpu.memory_space<vmem>>) attributes {dimension_semantics = [#tpu.dimension_semantics<parallel>, #tpu.dimension_semantics<arbitrary>], iteration_bounds = array<i64: 1, 1>, scalar_prefetch = 0 : i64, scratch_operands = 1 : i64, tpu.core_type = #tpu.core_type<tc>, window_params = [{transform_indices = @transform_0, window_bounds = array<i64: 16, 128>}, {pipeline_mode = #tpu.pipeline_mode<synchronous>, transform_indices = @transform_1, window_bounds = array<i64: 128, 512>}, {pipeline_mode = #tpu.pipeline_mode<synchronous>, transform_indices = @transform_2, window_bounds = array<i64: 1, 512>}, {pipeline_mode = #tpu.pipeline_mode<synchronous>, transform_indices = @transform_3, window_bounds = array<i64: 512, 128>}, {pipeline_mode = #tpu.pipeline_mode<synchronous>, transform_indices = @transform_4, window_bounds = array<i64: 1, 128>}, {transform_indices = @transform_5, window_bounds = array<i64: 16, 128>}]} {
    %c0_i32 = arith.constant 0 : i32
    %0 = arith.cmpi eq, %arg1, %c0_i32 : i32
    %1 = arith.extui %0 : i1 to i32
    %c0_i32_0 = arith.constant 0 : i32
    %2 = arith.cmpi ne, %1, %c0_i32_0 : i32
    scf.if %2 {
      %cst_18 = arith.constant 0.000000e+00 : f32
      %25 = vector.broadcast %cst_18 : f32 to vector<16x128xf32>
      %c0_19 = arith.constant 0 : index
      %c0_20 = arith.constant 0 : index
      %26 = vector.load %arg8[%c0_19, %c0_20] : memref<16x128xf32, #tpu.memory_space<vmem>>, vector<16x128xf32>
      tpu.vector_store %arg8[%c0_19, %c0_20], %25 {strides = array<i32>} : memref<16x128xf32, #tpu.memory_space<vmem>>, vector<16x128xf32>,
    } else {
    }
    %c0 = arith.constant 0 : index
    %c0_1 = arith.constant 0 : index
    %3 = vector.load %arg4[%c0, %c0_1] : memref<1x512xf32, #tpu.memory_space<vmem>>, vector<1x512xf32>
    %c0_2 = arith.constant 0 : index
    %c0_3 = arith.constant 0 : index
    %4 = vector.load %arg2[%c0_2, %c0_3] : memref<16x128xf32, #tpu.memory_space<vmem>>, vector<16x128xf32>
    %c0_4 = arith.constant 0 : index
    %c0_5 = arith.constant 0 : index
    %5 = vector.load %arg3[%c0_4, %c0_5] : memref<128x512xf32, #tpu.memory_space<vmem>>, vector<128x512xf32>
    %cst = arith.constant dense<0.000000e+00> : vector<16x512xf32>
    %6 = tpu.matmul %4, %5, %cst {dimension_numbers = #tpu.dot_dimension_numbers<[1], [0], [0], [1], [0, 0, 1, 1], [], []>} : vector<16x128xf32>, vector<128x512xf32>, vector<16x512xf32> -> vector<16x512xf32>
    %7 = vector.broadcast %3 : vector<1x512xf32> to vector<16x512xf32>
    %8 = arith.addf %6, %7 : vector<16x512xf32>
    %cst_6 = arith.constant 5.000000e-01 : f32
    %9 = vector.broadcast %cst_6 : f32 to vector<16x512xf32>
    %10 = arith.mulf %9, %8 : vector<16x512xf32>
    %cst_7 = arith.constant 0.707106769 : f32
    %11 = vector.broadcast %cst_7 : f32 to vector<16x512xf32>
    %12 = arith.mulf %8, %11 : vector<16x512xf32>
    %13 = math.erf %12 : vector<16x512xf32>
    %cst_8 = arith.constant 1.000000e+00 : f32
    %14 = vector.broadcast %cst_8 : f32 to vector<16x512xf32>
    %15 = arith.addf %14, %13 : vector<16x512xf32>
    %16 = arith.mulf %10, %15 : vector<16x512xf32>
    %c0_9 = arith.constant 0 : index
    %c0_10 = arith.constant 0 : index
    %17 = vector.load %arg8[%c0_9, %c0_10] : memref<16x128xf32, #tpu.memory_space<vmem>>, vector<16x128xf32>
    %c0_11 = arith.constant 0 : index
    %c0_12 = arith.constant 0 : index
    %18 = vector.load %arg5[%c0_11, %c0_12] : memref<512x128xf32, #tpu.memory_space<vmem>>, vector<512x128xf32>
    %cst_13 = arith.constant dense<0.000000e+00> : vector<16x128xf32>
    %19 = tpu.matmul %16, %18, %cst_13 {dimension_numbers = #tpu.dot_dimension_numbers<[1], [0], [0], [1], [0, 0, 1, 1], [], []>} : vector<16x512xf32>, vector<512x128xf32>, vector<16x128xf32> -> vector<16x128xf32>
    %20 = arith.addf %17, %19 : vector<16x128xf32>
    %c0_14 = arith.constant 0 : index
    %c0_15 = arith.constant 0 : index
    %21 = vector.load %arg8[%c0_14, %c0_15] : memref<16x128xf32, #tpu.memory_space<vmem>>, vector<16x128xf32>
    tpu.vector_store %arg8[%c0_14, %c0_15], %20 {strides = array<i32>} : memref<16x128xf32, #tpu.memory_space<vmem>>, vector<16x128xf32>,
    %c0_i32_16 = arith.constant 0 : i32
    %22 = arith.cmpi eq, %arg1, %c0_i32_16 : i32
    %23 = arith.extui %22 : i1 to i32
    %c0_i32_17 = arith.constant 0 : i32
    %24 = arith.cmpi ne, %23, %c0_i32_17 : i32
    scf.if %24 {
      %c0_18 = arith.constant 0 : index
      %c0_19 = arith.constant 0 : index
      %25 = vector.load %arg8[%c0_18, %c0_19] : memref<16x128xf32, #tpu.memory_space<vmem>>, vector<16x128xf32>
      %c0_20 = arith.constant 0 : index
      %c0_21 = arith.constant 0 : index
      %26 = vector.load %arg6[%c0_20, %c0_21] : memref<1x128xf32, #tpu.memory_space<vmem>>, vector<1x128xf32>
      %27 = vector.broadcast %26 : vector<1x128xf32> to vector<16x128xf32>
      %28 = arith.addf %25, %27 : vector<16x128xf32>
      %c0_22 = arith.constant 0 : index
      %c0_23 = arith.constant 0 : index
      %29 = vector.load %arg7[%c0_22, %c0_23] : memref<16x128xf32, #tpu.memory_space<vmem>>, vector<16x128xf32>
      tpu.vector_store %arg7[%c0_22, %c0_23], %28 {strides = array<i32>} : memref<16x128xf32, #tpu.memory_space<vmem>>, vector<16x128xf32>,
    } else {
    }
    return
  }
  func.func @transform_0(%arg0: i32, %arg1: i32) -> (i32, i32) {
    %c0_i32 = arith.constant 0 : i32
    %c0_i32_0 = arith.constant 0 : i32
    return %arg0, %c0_i32 : i32, i32
  }
  func.func @transform_1(%arg0: i32, %arg1: i32) -> (i32, i32) {
    %c0_i32 = arith.constant 0 : i32
    %c0_i32_0 = arith.constant 0 : i32
    return %c0_i32, %arg1 : i32, i32
  }
  func.func @transform_2(%arg0: i32, %arg1: i32) -> (i32, i32) {
    %c0_i32 = arith.constant 0 : i32
    %c0_i32_0 = arith.constant 0 : i32
    return %c0_i32, %arg1 : i32, i32
  }
  func.func @transform_3(%arg0: i32, %arg1: i32) -> (i32, i32) {
    %c0_i32 = arith.constant 0 : i32
    %c0_i32_0 = arith.constant 0 : i32
    return %arg1, %c0_i32 : i32, i32
  }
  func.func @transform_4(%arg0: i32, %arg1: i32) -> (i32, i32) {
    %c0_i32 = arith.constant 0 : i32
    %c0_i32_0 = arith.constant 0 : i32
    %c0_i32_1 = arith.constant 0 : i32
    return %c0_i32, %c0_i32_0 : i32, i32
  }
  func.func @transform_5(%arg0: i32, %arg1: i32) -> (i32, i32) {
    %c0_i32 = arith.constant 0 : i32
    %c0_i32_0 = arith.constant 0 : i32
    return %arg0, %c0_i32 : i32, i32
  }
}

module attributes {stable_mosaic.version = 11 : i64} {
  func.func @_mlp_kernel(%arg0: i32, %arg1: i32, %arg2: memref<16x128xf32, #tpu.memory_space<vmem>>, %arg3: memref<128x512xf32, #tpu.memory_space<vmem>>, %arg4: memref<1x512xf32, #tpu.memory_space<vmem>>, %arg5: memref<512x128xf32, #tpu.memory_space<vmem>>, %arg6: memref<1x128xf32, #tpu.memory_space<vmem>>, %arg7: memref<16x128xf32, #tpu.memory_space<vmem>>, %arg8: memref<16x128xf32, #tpu.memory_space<vmem>>) attributes {dimension_semantics = [#tpu.dimension_semantics<parallel>, #tpu.dimension_semantics<arbitrary>], iteration_bounds = array<i64: 1, 1>, scalar_prefetch = 0 : i64, scratch_operands = 1 : i64, tpu.core_type = #tpu.core_type<tc>, window_params = [{transform_indices = @transform_0, window_bounds = array<i64: 16, 128>}, {transform_indices = @transform_1, window_bounds = array<i64: 128, 512>}, {transform_indices = @transform_2, window_bounds = array<i64: 1, 512>}, {transform_indices = @transform_3, window_bounds = array<i64: 512, 128>}, {pipeline_mode = #tpu.pipeline_mode<synchronous>, transform_indices = @transform_4, window_bounds = array<i64: 1, 128>}, {transform_indices = @transform_5, window_bounds = array<i64: 16, 128>}]} {
    %c0_i32 = arith.constant 0 : i32
    %0 = arith.cmpi eq, %arg1, %c0_i32 : i32
    %1 = arith.extui %0 : i1 to i32
    %c0_i32_0 = arith.constant 0 : i32
    %2 = arith.cmpi ne, %1, %c0_i32_0 : i32
    scf.if %2 {
      %cst_18 = arith.constant 0.000000e+00 : f32
      %25 = vector.broadcast %cst_18 : f32 to vector<16x128xf32>
      %c0_19 = arith.constant 0 : index
      %c0_20 = arith.constant 0 : index
      %26 = vector.load %arg8[%c0_19, %c0_20] : memref<16x128xf32, #tpu.memory_space<vmem>>, vector<16x128xf32>
      tpu.vector_store %arg8[%c0_19, %c0_20], %25 {strides = array<i32>} : memref<16x128xf32, #tpu.memory_space<vmem>>, vector<16x128xf32>,
    } else {
    }
    %c0 = arith.constant 0 : index
    %c0_1 = arith.constant 0 : index
    %3 = vector.load %arg4[%c0, %c0_1] : memref<1x512xf32, #tpu.memory_space<vmem>>, vector<1x512xf32>
    %c0_2 = arith.constant 0 : index
    %c0_3 = arith.constant 0 : index
    %4 = vector.load %arg2[%c0_2, %c0_3] : memref<16x128xf32, #tpu.memory_space<vmem>>, vector<16x128xf32>
    %c0_4 = arith.constant 0 : index
    %c0_5 = arith.constant 0 : index
    %5 = vector.load %arg3[%c0_4, %c0_5] : memref<128x512xf32, #tpu.memory_space<vmem>>, vector<128x512xf32>
    %cst = arith.constant dense<0.000000e+00> : vector<16x512xf32>
    %6 = tpu.matmul %4, %5, %cst {dimension_numbers = #tpu.dot_dimension_numbers<[1], [0], [0], [1], [0, 0, 1, 1], [], []>} : vector<16x128xf32>, vector<128x512xf32>, vector<16x512xf32> -> vector<16x512xf32>
    %7 = vector.broadcast %3 : vector<1x512xf32> to vector<16x512xf32>
    %8 = arith.addf %6, %7 : vector<16x512xf32>
    %cst_6 = arith.constant 5.000000e-01 : f32
    %9 = vector.broadcast %cst_6 : f32 to vector<16x512xf32>
    %10 = arith.mulf %9, %8 : vector<16x512xf32>
    %cst_7 = arith.constant 0.707106769 : f32
    %11 = vector.broadcast %cst_7 : f32 to vector<16x512xf32>
    %12 = arith.mulf %8, %11 : vector<16x512xf32>
    %13 = math.erf %12 : vector<16x512xf32>
    %cst_8 = arith.constant 1.000000e+00 : f32
    %14 = vector.broadcast %cst_8 : f32 to vector<16x512xf32>
    %15 = arith.addf %14, %13 : vector<16x512xf32>
    %16 = arith.mulf %10, %15 : vector<16x512xf32>
    %c0_9 = arith.constant 0 : index
    %c0_10 = arith.constant 0 : index
    %17 = vector.load %arg8[%c0_9, %c0_10] : memref<16x128xf32, #tpu.memory_space<vmem>>, vector<16x128xf32>
    %c0_11 = arith.constant 0 : index
    %c0_12 = arith.constant 0 : index
    %18 = vector.load %arg5[%c0_11, %c0_12] : memref<512x128xf32, #tpu.memory_space<vmem>>, vector<512x128xf32>
    %cst_13 = arith.constant dense<0.000000e+00> : vector<16x128xf32>
    %19 = tpu.matmul %16, %18, %cst_13 {dimension_numbers = #tpu.dot_dimension_numbers<[1], [0], [0], [1], [0, 0, 1, 1], [], []>} : vector<16x512xf32>, vector<512x128xf32>, vector<16x128xf32> -> vector<16x128xf32>
    %20 = arith.addf %17, %19 : vector<16x128xf32>
    %c0_14 = arith.constant 0 : index
    %c0_15 = arith.constant 0 : index
    %21 = vector.load %arg8[%c0_14, %c0_15] : memref<16x128xf32, #tpu.memory_space<vmem>>, vector<16x128xf32>
    tpu.vector_store %arg8[%c0_14, %c0_15], %20 {strides = array<i32>} : memref<16x128xf32, #tpu.memory_space<vmem>>, vector<16x128xf32>,
    %c0_i32_16 = arith.constant 0 : i32
    %22 = arith.cmpi eq, %arg1, %c0_i32_16 : i32
    %23 = arith.extui %22 : i1 to i32
    %c0_i32_17 = arith.constant 0 : i32
    %24 = arith.cmpi ne, %23, %c0_i32_17 : i32
    scf.if %24 {
      %c0_18 = arith.constant 0 : index
      %c0_19 = arith.constant 0 : index
      %25 = vector.load %arg8[%c0_18, %c0_19] : memref<16x128xf32, #tpu.memory_space<vmem>>, vector<16x128xf32>
      %c0_20 = arith.constant 0 : index
      %c0_21 = arith.constant 0 : index
      %26 = vector.load %arg6[%c0_20, %c0_21] : memref<1x128xf32, #tpu.memory_space<vmem>>, vector<1x128xf32>
      %27 = vector.broadcast %26 : vector<1x128xf32> to vector<16x128xf32>
      %28 = arith.addf %25, %27 : vector<16x128xf32>
      %c0_22 = arith.constant 0 : index
      %c0_23 = arith.constant 0 : index
      %29 = vector.load %arg7[%c0_22, %c0_23] : memref<16x128xf32, #tpu.memory_space<vmem>>, vector<16x128xf32>
      tpu.vector_store %arg7[%c0_22, %c0_23], %28 {strides = array<i32>} : memref<16x128xf32, #tpu.memory_space<vmem>>, vector<16x128xf32>,
    } else {
    }
    return
  }
  func.func @transform_0(%arg0: i32, %arg1: i32) -> (i32, i32) {
    %c0_i32 = arith.constant 0 : i32
    %c0_i32_0 = arith.constant 0 : i32
    return %arg0, %c0_i32 : i32, i32
  }
  func.func @transform_1(%arg0: i32, %arg1: i32) -> (i32, i32) {
    %c0_i32 = arith.constant 0 : i32
    %c0_i32_0 = arith.constant 0 : i32
    return %c0_i32, %arg1 : i32, i32
  }
  func.func @transform_2(%arg0: i32, %arg1: i32) -> (i32, i32) {
    %c0_i32 = arith.constant 0 : i32
    %c0_i32_0 = arith.constant 0 : i32
    return %c0_i32, %arg1 : i32, i32
  }
  func.func @transform_3(%arg0: i32, %arg1: i32) -> (i32, i32) {
    %c0_i32 = arith.constant 0 : i32
    %c0_i32_0 = arith.constant 0 : i32
    return %arg1, %c0_i32 : i32, i32
  }
  func.func @transform_4(%arg0: i32, %arg1: i32) -> (i32, i32) {
    %c0_i32 = arith.constant 0 : i32
    %c0_i32_0 = arith.constant 0 : i32
    %c0_i32_1 = arith.constant 0 : i32
    return %c0_i32, %c0_i32_0 : i32, i32
  }
  func.func @transform_5(%arg0: i32, %arg1: i32) -> (i32, i32) {
    %c0_i32 = arith.constant 0 : i32
    %c0_i32_0 = arith.constant 0 : i32
    return %arg0, %c0_i32 : i32, i32
  }
}

</mosaic_0001>

<bundles_post_ra>
// kernel: _mlp_pallas_2d.1
= control target key start
LH: loop header
LB: loop body
LE: loop exit
PB: predicated region body
PF: predicated region fallthrough
CT: control target
= control target key end

     0   :  { %10 = vsyncpa [#allocation4], 0  ;;  %s899_s0 = inlined_call_operand.hbm [shape: f32[16,128], index: 0, kind: input, shape index: {}]   ;;  %s900_s1 = inlined_call_operand.hbm [shape: f32[128,512], index: 1, kind: input, shape index: {}]   ;;  %s901_s2 = inlined_call_operand.hbm [shape: f32[1,512], index: 2, kind: input, shape index: {}]   ;;  %s902_s3 = inlined_call_operand.hbm [shape: f32[512,128], index: 3, kind: input, shape index: {}]   ;;  %s903_s4 = inlined_call_operand.vmem [shape: f32[1,128], index: 4, kind: input, shape index: {}]   ;;  %s904_s5 = inlined_call_operand.hbm [shape: f32[16,128], index: 5, kind: output, shape index: {}]  }
   0x1   :  { %11 = vsyncpa [#allocation7], 0 }
   0x2   :  { %12 = vsyncpa [#allocation10], 0 }
   0x3   :  { %13 = vsyncpa [#allocation5], 0  ;;  %s828_s18 = smov [#allocation6]  }
   0x4   :  { %s31_s19 = sshll.u32 %s828_s18, 4  ;;  %s32_s19 = int_to_ptr.vmem [resolvable:$true] %s31_s19 }
   0x5   :  { %s728_s20 = scalar_lea.vmem %s32_s19, 8192  ;;  %p733_p1 = scmp.lt.s32.totalorder %s32_s19, %s32_s19 }
   0x6   :  { %p729_p0 = scmp.ne.s32.totalorder %s32_s19, %s728_s20  ;;  %p734_p2 = scmp.lt.s32.totalorder %s728_s20, %s728_s20 }
   0x8   :  { %p735_p3 = por %p734_p2, %p733_p1 }
   0xa   :  { %p736_p4 = pnand %p735_p3, %p729_p0 }
   0xc   :  { %739 = shalt.err (!%p736_p4)
}
   0xd   :  { %s829_s21 = smov 512   ;;  %s830_s22 = smov 32  }
   0xe   :  { %37 = dma.hbm_to_vmem [thread:$0]  %s900_s1, 8192, %s32_s19, [#allocation7], %s829_s21, %s829_s21, %s830_s22  }
   0xf   :  { %s831_s25 = smov [#allocation3]  }
  0x10   :  { %s19_s26 = sshll.u32 %s831_s25, 4  ;;  %s20_s26 = int_to_ptr.vmem [resolvable:$true] %s19_s26 }
  0x11   :  { %s748_s27 = scalar_lea.vmem %s20_s26, 256  ;;  %p753_p6 = scmp.lt.s32.totalorder %s20_s26, %s20_s26 }
  0x12   :  { %p749_p5 = scmp.ne.s32.totalorder %s20_s26, %s748_s27  ;;  %p754_p7 = scmp.lt.s32.totalorder %s748_s27, %s748_s27 }
  0x14   :  { %p755_p8 = por %p754_p7, %p753_p6 }
  0x16   :  { %p756_p9 = pnand %p755_p8, %p749_p5 }
  0x18   :  { %759 = shalt.err (!%p756_p9)
}
  0x19   :  { %s832_s28 = smov 128   ;;  %s833_s29 = smov 8  }
  0x1a   :  { %25 = dma.hbm_to_vmem [thread:$0]  %s899_s0, 256, %s20_s26, [#allocation4], %s832_s28, %s832_s28, %s833_s29  }
  0x1b   :  { %s834_s1 = smov [#allocation8]   ;;  %s835_s8 = smov [#allocation9]  }
  0x1c   :  { %s44_s7 = sshll.u32 %s834_s1, 4  ;;  %s53_s9 = sshll.u32 %s835_s8, 4  ;;  %s45_s7 = int_to_ptr.vmem [resolvable:$true] %s44_s7  ;;  %s54_s9 = int_to_ptr.vmem [resolvable:$true] %s53_s9 }
  0x1d   :  { %s768_s10 = scalar_lea.vmem %s45_s7, 64  ;;  %p773_p11 = scmp.lt.s32.totalorder %s45_s7, %s45_s7 }
  0x1e   :  { %p769_p10 = scmp.ne.s32.totalorder %s45_s7, %s768_s10  ;;  %p774_p12 = scmp.lt.s32.totalorder %s768_s10, %s768_s10 }
  0x20   :  { %p775_p13 = por %p774_p12, %p773_p11 }
  0x22   :  { %p776_p0 = pnand %p775_p13, %p769_p10 }
  0x24   :  { %779 = shalt.err (!%p776_p0)
}
  0x25   :  { %47 = dma.hbm_to_vmem [thread:$0]  %s901_s2, 64, %s45_s7, [#allocation7]  }
  0x26   :  { %s788_s13 = scalar_lea.vmem %s54_s9, 8192  ;;  %p793_p2 = scmp.lt.s32.totalorder %s54_s9, %s54_s9 }
  0x27   :  { %p789_p1 = scmp.ne.s32.totalorder %s54_s9, %s788_s13  ;;  %p794_p3 = scmp.lt.s32.totalorder %s788_s13, %s788_s13 }
  0x29   :  { %p795_p4 = por %p794_p3, %p793_p2 }
  0x2b   :  { %p796_p5 = pnand %p795_p4, %p789_p1 }
  0x2d   :  { %799 = shalt.err (!%p796_p5)
}
  0x2e   :  { %59 = dma.hbm_to_vmem [thread:$0]  %s902_s3, 8192, %s54_s9, [#allocation10], %s832_s28, %s832_s28, %s833_s29  }
  0x2f   :  { %820 = dma.done.wait [#allocation4], 256  }
  0x30   :  { %821 = vsyncadd [#allocation4], 4294967040 }
  0x31   :  { %822 = dma.done.wait [#allocation7], 8256  }
  0x32   :  { %823 = vsyncadd [#allocation7], 4294959040 }
  0x33   :  { %824 = dma.done.wait [#allocation10], 8192  }
  0x34   :  { %825 = vsyncadd [#allocation10], 4294959104  ;;  %v836_v0 = vmov 0.0   ;;  %v144_v1 = vld [vmem:[#allocation6 + $0x1e8] sm:$0xff]  ;;  %v146_v2 = vld [vmem:[#allocation6 + $0x1f8] sm:$0xff]  ;;  %s837_s15 = smov [#allocation11]  }
  0x35   :  { %232 = vmatprep.mubr.f32.mxu0 %v836_v0  ;;  %309 = vmatprep.mubr.f32.mxu1 %v836_v0  ;;  %v143_v3 = vld [vmem:[#allocation6 + $0x1e0] sm:$0xff]  ;;  %v145_v4 = vld [vmem:[#allocation6 + $0x1f0] sm:$0xff]  ;;  %v140_v5 = vld [vmem:[#allocation6 + $0x1c8] sm:$0xff]  ;;  %s603_s16 = sshll.u32 %s837_s15, 4  ;;  %s604_s16 = int_to_ptr.vmem [resolvable:$true] %s603_s16 }
  0x36   :  { %168 = vmatprep.subr.mxu0 %v144_v1  ;;  %245 = vmatprep.subr.mxu1 %v146_v2  ;;  %v142_v6 = vld [vmem:[#allocation6 + $0x1d8] sm:$0xff]  ;;  %v139_v7 = vld [vmem:[#allocation6 + $0x1c0] sm:$0xff]  ;;  %v141_v8 = vld [vmem:[#allocation6 + $0x1d0] sm:$0xff]  ;;  %s800_s17 = scalar_lea.vmem %s604_s16, 256  ;;  %p805_p7 = scmp.lt.s32.totalorder %s604_s16, %s604_s16 }
  0x37   :  { %169 = vmatpush1.msra.mxu0 %v143_v3  ;;  %246 = vmatpush1.msra.mxu1 %v145_v4  ;;  %v136_v9 = vld [vmem:[#allocation6 + $0x1a8] sm:$0xff]  ;;  %v138_v10 = vld [vmem:[#allocation6 + $0x1b8] sm:$0xff]  ;;  %v135_v11 = vld [vmem:[#allocation6 + $0x1a0] sm:$0xff]  ;;  %p801_p6 = scmp.ne.s32.totalorder %s604_s16, %s800_s17  ;;  %p806_p8 = scmp.lt.s32.totalorder %s800_s17, %s800_s17 }
  0x38   :  { %170 = vmatprep.subr.mxu0 %v140_v5  ;;  %247 = vmatprep.subr.mxu1 %v142_v6  ;;  %v137_v12 = vld [vmem:[#allocation6 + $0x1b0] sm:$0xff]  ;;  %v132_v13 = vld [vmem:[#allocation6 + $0x188] sm:$0xff]  ;;  %v134_v14 = vld [vmem:[#allocation6 + $0x198] sm:$0xff] }
  0x39   :  { %171 = vmatpush1.msra.mxu0 %v139_v7  ;;  %248 = vmatpush1.msra.mxu1 %v141_v8  ;;  %v131_v15 = vld [vmem:[#allocation6 + $0x180] sm:$0xff]  ;;  %v133_v16 = vld [vmem:[#allocation6 + $0x190] sm:$0xff]  ;;  %v128_v17 = vld [vmem:[#allocation6 + $0x168] sm:$0xff]  ;;  %p807_p9 = por %p806_p8, %p805_p7 }
  0x3a   :  { %172 = vmatprep.subr.mxu0 %v136_v9  ;;  %249 = vmatprep.subr.mxu1 %v138_v10  ;;  %v130_v18 = vld [vmem:[#allocation6 + $0x178] sm:$0xff]  ;;  %v127_v19 = vld [vmem:[#allocation6 + $0x160] sm:$0xff]  ;;  %v129_v20 = vld [vmem:[#allocation6 + $0x170] sm:$0xff] }
  0x3b   :  { %173 = vmatpush1.msra.mxu0 %v135_v11  ;;  %250 = vmatpush1.msra.mxu1 %v137_v12  ;;  %v124_v21 = vld [vmem:[#allocation6 + $0x148] sm:$0xff]  ;;  %v126_v22 = vld [vmem:[#allocation6 + $0x158] sm:$0xff]  ;;  %v123_v23 = vld [vmem:[#allocation6 + $0x140] sm:$0xff]  ;;  %p808_p10 = pnand %p807_p9, %p801_p6 }
  0x3c   :  { %174 = vmatprep.subr.mxu0 %v132_v13  ;;  %251 = vmatprep.subr.mxu1 %v134_v14  ;;  %v125_v24 = vld [vmem:[#allocation6 + $0x150] sm:$0xff]  ;;  %v120_v25 = vld [vmem:[#allocation6 + $0x128] sm:$0xff]  ;;  %v122_v26 = vld [vmem:[#allocation6 + $0x138] sm:$0xff] }
  0x3d   :  { %175 = vmatpush1.msra.mxu0 %v131_v15  ;;  %252 = vmatpush1.msra.mxu1 %v133_v16  ;;  %v119_v27 = vld [vmem:[#allocation6 + $0x120] sm:$0xff]  ;;  %v121_v28 = vld [vmem:[#allocation6 + $0x130] sm:$0xff]  ;;  %v116_v29 = vld [vmem:[#allocation6 + $0x108] sm:$0xff] }
  0x3e   :  { %176 = vmatprep.subr.mxu0 %v128_v17  ;;  %253 = vmatprep.subr.mxu1 %v130_v18  ;;  %v118_v30 = vld [vmem:[#allocation6 + $0x118] sm:$0xff]  ;;  %v115_v31 = vld [vmem:[#allocation6 + $0x100] sm:$0xff]  ;;  %v117_v32 = vld [vmem:[#allocation6 + $0x110] sm:$0xff] }
  0x3f   :  { %177 = vmatpush1.msra.mxu0 %v127_v19  ;;  %254 = vmatpush1.msra.mxu1 %v129_v20  ;;  %v112_v33 = vld [vmem:[#allocation6 + $0xe8] sm:$0xff]  ;;  %v114_v34 = vld [vmem:[#allocation6 + $0xf8] sm:$0xff]  ;;  %v111_v35 = vld [vmem:[#allocation6 + $0xe0] sm:$0xff] }
  0x40   :  { %178 = vmatprep.subr.mxu0 %v124_v21  ;;  %255 = vmatprep.subr.mxu1 %v126_v22  ;;  %v113_v36 = vld [vmem:[#allocation6 + $0xf0] sm:$0xff]  ;;  %v108_v37 = vld [vmem:[#allocation6 + $0xc8] sm:$0xff]  ;;  %v110_v38 = vld [vmem:[#allocation6 + $0xd8] sm:$0xff] }
  0x41   :  { %179 = vmatpush1.msra.mxu0 %v123_v23  ;;  %256 = vmatpush1.msra.mxu1 %v125_v24  ;;  %v107_v39 = vld [vmem:[#allocation6 + $0xc0] sm:$0xff]  ;;  %v109_v40 = vld [vmem:[#allocation6 + $0xd0] sm:$0xff]  ;;  %v104_v41 = vld [vmem:[#allocation6 + $0xa8] sm:$0xff] }
  0x42   :  { %180 = vmatprep.subr.mxu0 %v120_v25  ;;  %257 = vmatprep.subr.mxu1 %v122_v26  ;;  %v106_v42 = vld [vmem:[#allocation6 + $0xb8] sm:$0xff]  ;;  %v103_v43 = vld [vmem:[#allocation6 + $0xa0] sm:$0xff]  ;;  %v105_v44 = vld [vmem:[#allocation6 + $0xb0] sm:$0xff] }
  0x43   :  { %181 = vmatpush1.msra.mxu0 %v119_v27  ;;  %258 = vmatpush1.msra.mxu1 %v121_v28  ;;  %v100_v45 = vld [vmem:[#allocation6 + $0x88] sm:$0xff]  ;;  %v102_v46 = vld [vmem:[#allocation6 + $0x98] sm:$0xff]  ;;  %v99_v47 = vld [vmem:[#allocation6 + $0x80] sm:$0xff] }
  0x44   :  { %182 = vmatprep.subr.mxu0 %v116_v29  ;;  %259 = vmatprep.subr.mxu1 %v118_v30  ;;  %v101_v48 = vld [vmem:[#allocation6 + $0x90] sm:$0xff]  ;;  %v96_v49 = vld [vmem:[#allocation6 + $0x68] sm:$0xff]  ;;  %v98_v50 = vld [vmem:[#allocation6 + $0x78] sm:$0xff] }
  0x45   :  { %183 = vmatpush1.msra.mxu0 %v115_v31  ;;  %260 = vmatpush1.msra.mxu1 %v117_v32  ;;  %v95_v51 = vld [vmem:[#allocation6 + $0x60] sm:$0xff]  ;;  %v97_v52 = vld [vmem:[#allocation6 + $0x70] sm:$0xff]  ;;  %v92_v53 = vld [vmem:[#allocation6 + $0x48] sm:$0xff] }
  0x46   :  { %184 = vmatprep.subr.mxu0 %v112_v33  ;;  %261 = vmatprep.subr.mxu1 %v114_v34  ;;  %v94_v54 = vld [vmem:[#allocation6 + $0x58] sm:$0xff]  ;;  %v91_v55 = vld [vmem:[#allocation6 + $0x40] sm:$0xff]  ;;  %v93_v56 = vld [vmem:[#allocation6 + $0x50] sm:$0xff] }
  0x47   :  { %185 = vmatpush1.msra.mxu0 %v111_v35  ;;  %262 = vmatpush1.msra.mxu1 %v113_v36  ;;  %v88_v57 = vld [vmem:[#allocation6 + $0x28] sm:$0xff]  ;;  %v90_v58 = vld [vmem:[#allocation6 + $0x38] sm:$0xff]  ;;  %v87_v59 = vld [vmem:[#allocation6 + $0x20] sm:$0xff] }
  0x48   :  { %186 = vmatprep.subr.mxu0 %v108_v37  ;;  %263 = vmatprep.subr.mxu1 %v110_v38  ;;  %v89_v60 = vld [vmem:[#allocation6 + $0x30] sm:$0xff]  ;;  %v84_v61 = vld [vmem:[#allocation6 + $0x8] sm:$0xff]  ;;  %v86_v62 = vld [vmem:[#allocation6 + $0x18] sm:$0xff] }
  0x49   :  { %187 = vmatpush1.msra.mxu0 %v107_v39  ;;  %264 = vmatpush1.msra.mxu1 %v109_v40  ;;  %v83_v63 = vld [vmem:[#allocation6] sm:$0xff]  ;;  %v85_v1 = vld [vmem:[#allocation6 + $0x10] sm:$0xff]  ;;  %v82_v7 = vld [vmem:[#allocation3 + $0x8] sm:$0xff] }
  0x4a   :  { %188 = vmatprep.subr.mxu0 %v104_v41  ;;  %265 = vmatprep.subr.mxu1 %v106_v42  ;;  %v81_v2 = vld [vmem:[#allocation3] sm:$0xff]  ;;  %v395_v3 = vld [vmem:[#allocation9 + $0xf8] sm:$0xff]  ;;  %v424_v16 = vld [vmem:[#allocation9 + $0x1e0] sm:$0xff] }
  0x4b   :  { %189 = vmatpush1.msra.mxu0 %v103_v43  ;;  %266 = vmatpush1.msra.mxu1 %v105_v44  ;;  %v427_v4 = vld [vmem:[#allocation9 + $0x1f8] sm:$0xff]  ;;  %v394_v8 = vld [vmem:[#allocation9 + $0xf0] sm:$0xff]  ;;  %v393_v12 = vld [vmem:[#allocation9 + $0xe8] sm:$0xff] }
  0x4c   :  { %190 = vmatprep.subr.mxu0 %v100_v45  ;;  %267 = vmatprep.subr.mxu1 %v102_v46  ;;  %v379_v5 = vld [vmem:[#allocation9 + $0x78] sm:$0xff]  ;;  %v426_v9 = vld [vmem:[#allocation9 + $0x1f0] sm:$0xff]  ;;  %v425_v13 = vld [vmem:[#allocation9 + $0x1e8] sm:$0xff] }
  0x4d   :  { %191 = vmatpush1.msra.mxu0 %v99_v47  ;;  %268 = vmatpush1.msra.mxu1 %v101_v48  ;;  %v411_v6 = vld [vmem:[#allocation9 + $0x178] sm:$0xff]  ;;  %v378_v10 = vld [vmem:[#allocation9 + $0x70] sm:$0xff]  ;;  %v377_v14 = vld [vmem:[#allocation9 + $0x68] sm:$0xff] }
  0x4e   :  { %192 = vmatprep.subr.mxu0 %v96_v49  ;;  %269 = vmatprep.subr.mxu1 %v98_v50  ;;  %v410_v11 = vld [vmem:[#allocation9 + $0x170] sm:$0xff]  ;;  %v409_v15 = vld [vmem:[#allocation9 + $0x168] sm:$0xff]  ;;  %v376_v17 = vld [vmem:[#allocation9 + $0x60] sm:$0xff] }
  0x4f   :  { %193 = vmatpush1.msra.mxu0 %v95_v51  ;;  %270 = vmatpush1.msra.mxu1 %v97_v52  ;;  %v408_v18 = vld [vmem:[#allocation9 + $0x160] sm:$0xff]  ;;  %v391_v19 = vld [vmem:[#allocation9 + $0xd8] sm:$0xff]  ;;  %v390_v23 = vld [vmem:[#allocation9 + $0xd0] sm:$0xff] }
  0x50   :  { %194 = vmatprep.subr.mxu0 %v92_v53  ;;  %271 = vmatprep.subr.mxu1 %v94_v54  ;;  %v423_v20 = vld [vmem:[#allocation9 + $0x1d8] sm:$0xff]  ;;  %v422_v24 = vld [vmem:[#allocation9 + $0x1d0] sm:$0xff]  ;;  %v389_v27 = vld [vmem:[#allocation9 + $0xc8] sm:$0xff] }
  0x51   :  { %195 = vmatpush1.msra.mxu0 %v91_v55  ;;  %272 = vmatpush1.msra.mxu1 %v93_v56  ;;  %v375_v21 = vld [vmem:[#allocation9 + $0x58] sm:$0xff]  ;;  %v374_v25 = vld [vmem:[#allocation9 + $0x50] sm:$0xff]  ;;  %v421_v28 = vld [vmem:[#allocation9 + $0x1c8] sm:$0xff] }
  0x52   :  { %196 = vmatprep.subr.mxu0 %v88_v57  ;;  %273 = vmatprep.subr.mxu1 %v90_v58  ;;  %v407_v22 = vld [vmem:[#allocation9 + $0x158] sm:$0xff]  ;;  %v406_v26 = vld [vmem:[#allocation9 + $0x150] sm:$0xff]  ;;  %v373_v29 = vld [vmem:[#allocation9 + $0x48] sm:$0xff] }
  0x53   :  { %197 = vmatpush1.msra.mxu0 %v87_v59  ;;  %274 = vmatpush1.msra.mxu1 %v89_v60  ;;  %v405_v30 = vld [vmem:[#allocation9 + $0x148] sm:$0xff]  ;;  %v388_v31 = vld [vmem:[#allocation9 + $0xc0] sm:$0xff]  ;;  %v387_v35 = vld [vmem:[#allocation9 + $0xb8] sm:$0xff] }
  0x54   :  { %198 = vmatprep.subr.mxu0 %v84_v61  ;;  %275 = vmatprep.subr.mxu1 %v86_v62  ;;  %v420_v32 = vld [vmem:[#allocation9 + $0x1c0] sm:$0xff]  ;;  %v419_v36 = vld [vmem:[#allocation9 + $0x1b8] sm:$0xff]  ;;  %v386_v39 = vld [vmem:[#allocation9 + $0xb0] sm:$0xff] }
  0x55   :  { %199 = vmatpush1.msra.mxu0 %v83_v63  ;;  %276 = vmatpush1.msra.mxu1 %v85_v1  ;;  %v372_v33 = vld [vmem:[#allocation9 + $0x40] sm:$0xff]  ;;  %v371_v37 = vld [vmem:[#allocation9 + $0x38] sm:$0xff]  ;;  %v418_v40 = vld [vmem:[#allocation9 + $0x1b0] sm:$0xff] }
  0x56   :  { %233 = vmatmul.mubr.f32.vlgmr.msra.gmra.mxu0 %v81_v2  ;;  %310 = vmatmul.mubr.f32.vlgmr.msra.gmra.mxu1 %v81_v2  ;;  %v404_v34 = vld [vmem:[#allocation9 + $0x140] sm:$0xff]  ;;  %v403_v38 = vld [vmem:[#allocation9 + $0x138] sm:$0xff]  ;;  %v370_v41 = vld [vmem:[#allocation9 + $0x30] sm:$0xff] }
  0x57   :  { %238 = vmatprep.mubr.f32.mxu0 %v836_v0  ;;  %315 = vmatprep.mubr.f32.mxu1 %v836_v0  ;;  %v392_v0 = vld [vmem:[#allocation9 + $0xe0] sm:$0xff]  ;;  %v402_v42 = vld [vmem:[#allocation9 + $0x130] sm:$0xff]  ;;  %v385_v43 = vld [vmem:[#allocation9 + $0xa8] sm:$0xff] }
  0x58   :  { %618 = vmatprep.subr.mxu0 %v395_v3  ;;  %656 = vmatprep.subr.mxu1 %v427_v4  ;;  %v417_v44 = vld [vmem:[#allocation9 + $0x1a8] sm:$0xff]  ;;  %v384_v47 = vld [vmem:[#allocation9 + $0xa0] sm:$0xff]  ;;  %v383_v51 = vld [vmem:[#allocation9 + $0x98] sm:$0xff]  ;;  %v148_v4 = vlaneseq }
  0x59   :  { %619 = vmatpush3.msra.mxu0 %v379_v5  ;;  %657 = vmatpush3.msra.mxu1 %v411_v6  ;;  %v369_v45 = vld [vmem:[#allocation9 + $0x28] sm:$0xff]  ;;  %v416_v48 = vld [vmem:[#allocation9 + $0x1a0] sm:$0xff]  ;;  %v415_v52 = vld [vmem:[#allocation9 + $0x198] sm:$0xff] }
  0x5a   :  { %239 = vmatmul.mubr.f32.gmra.mxu0 %v82_v7  ;;  %316 = vmatmul.mubr.f32.gmra.mxu1 %v82_v7  ;;  %v401_v46 = vld [vmem:[#allocation9 + $0x128] sm:$0xff]  ;;  %v368_v49 = vld [vmem:[#allocation9 + $0x20] sm:$0xff]  ;;  %v367_v53 = vld [vmem:[#allocation9 + $0x18] sm:$0xff]  ;;  %v149_v5 = vshrl.u32 %v148_v4, 7 }
  0x5b   :  { %620 = vmatprep.subr.mxu0 %v394_v8  ;;  %658 = vmatprep.subr.mxu1 %v426_v9  ;;  %v400_v50 = vld [vmem:[#allocation9 + $0x120] sm:$0xff]  ;;  %v399_v54 = vld [vmem:[#allocation9 + $0x118] sm:$0xff]  ;;  %v382_v55 = vld [vmem:[#allocation9 + $0x90] sm:$0xff] }
  0x5c   :  { %621 = vmatpush3.msra.mxu0 %v378_v10  ;;  %659 = vmatpush3.msra.mxu1 %v410_v11  ;;  %v414_v56 = vld [vmem:[#allocation9 + $0x190] sm:$0xff]  ;;  %v381_v59 = vld [vmem:[#allocation9 + $0x88] sm:$0xff]  ;;  %v380_v63 = vld [vmem:[#allocation9 + $0x80] sm:$0xff]  ;;  %v150_v6 = vsub.s32 0, %v149_v5  ;;  %v158_v7 = vsub.s32 2, %v149_v5  ;;  %v154_v9 = vsub.s32 1, %v149_v5 }
  0x5d   :  { %622 = vmatprep.subr.mxu0 %v393_v12  ;;  %660 = vmatprep.subr.mxu1 %v425_v13  ;;  %v366_v57 = vld [vmem:[#allocation9 + $0x10] sm:$0xff]  ;;  %v413_v60 = vld [vmem:[#allocation9 + $0x188] sm:$0xff]  ;;  %v412_v1 = vld [vmem:[#allocation9 + $0x180] sm:$0xff]  ;;  %v162_v10 = vsub.s32 3, %v149_v5 }
  0x5e   :  { %623 = vmatpush3.msra.mxu0 %v377_v14  ;;  %661 = vmatpush3.msra.mxu1 %v409_v15  ;;  %v398_v58 = vld [vmem:[#allocation9 + $0x110] sm:$0xff]  ;;  %v365_v61 = vld [vmem:[#allocation9 + $0x8] sm:$0xff]  ;;  %v364_v2 = vld [vmem:[#allocation9] sm:$0xff] }
  0x5f   :  { %624 = vmatprep.subr.mxu0 %v392_v0  ;;  %662 = vmatprep.subr.mxu1 %v424_v16  ;;  %v397_v62 = vld [vmem:[#allocation9 + $0x108] sm:$0xff]  ;;  %v396_v3 = vld [vmem:[#allocation9 + $0x100] sm:$0xff]  ;;  %v80_v8 = vld [vmem:[#allocation8] sm:$0xf] }
  0x60   :  { %625 = vmatpush3.msra.mxu0 %v376_v17  ;;  %663 = vmatpush3.msra.mxu1 %v408_v18  ;;  %v151_v11 = vrot.slane %v80_v8, %v150_v6  ;;  %v159_v12 = vrot.slane %v80_v8, %v158_v7  ;;  %v155_v15 = vrot.slane %v80_v8, %v154_v9 }
  0x61   :  { %626 = vmatprep.subr.mxu0 %v391_v19  ;;  %664 = vmatprep.subr.mxu1 %v423_v20  ;;  %v163_v0 = vrot.slane %v80_v8, %v162_v10 }
  0x62   :  { %627 = vmatpush3.msra.mxu0 %v375_v21  ;;  %665 = vmatpush3.msra.mxu1 %v407_v22 }
  0x63   :  { %628 = vmatprep.subr.mxu0 %v390_v23  ;;  %666 = vmatprep.subr.mxu1 %v422_v24 }
  0x64   :  { %629 = vmatpush3.msra.mxu0 %v374_v25  ;;  %667 = vmatpush3.msra.mxu1 %v406_v26 }
  0x65   :  { %630 = vmatprep.subr.mxu0 %v389_v27  ;;  %668 = vmatprep.subr.mxu1 %v421_v28 }
  0x66   :  { %631 = vmatpush3.msra.mxu0 %v373_v29  ;;  %669 = vmatpush3.msra.mxu1 %v405_v30 }
  0x67   :  { %632 = vmatprep.subr.mxu0 %v388_v31  ;;  %670 = vmatprep.subr.mxu1 %v420_v32 }
  0x68   :  { %633 = vmatpush3.msra.mxu0 %v372_v33  ;;  %671 = vmatpush3.msra.mxu1 %v404_v34 }
  0x69   :  { %634 = vmatprep.subr.mxu0 %v387_v35  ;;  %672 = vmatprep.subr.mxu1 %v419_v36 }
  0x6a   :  { %635 = vmatpush3.msra.mxu0 %v371_v37  ;;  %673 = vmatpush3.msra.mxu1 %v403_v38 }
  0x6b   :  { %636 = vmatprep.subr.mxu0 %v386_v39  ;;  %674 = vmatprep.subr.mxu1 %v418_v40 }
  0x6c   :  { %637 = vmatpush3.msra.mxu0 %v370_v41  ;;  %675 = vmatpush3.msra.mxu1 %v402_v42 }
  0x6d   :  { %638 = vmatprep.subr.mxu0 %v385_v43  ;;  %676 = vmatprep.subr.mxu1 %v417_v44 }
  0x6e   :  { %639 = vmatpush3.msra.mxu0 %v369_v45  ;;  %677 = vmatpush3.msra.mxu1 %v401_v46 }
  0x6f   :  { %640 = vmatprep.subr.mxu0 %v384_v47  ;;  %678 = vmatprep.subr.mxu1 %v416_v48 }
  0x70   :  { %641 = vmatpush3.msra.mxu0 %v368_v49  ;;  %679 = vmatpush3.msra.mxu1 %v400_v50 }
  0x71   :  { %642 = vmatprep.subr.mxu0 %v383_v51  ;;  %680 = vmatprep.subr.mxu1 %v415_v52 }
  0x72   :  { %643 = vmatpush3.msra.mxu0 %v367_v53  ;;  %681 = vmatpush3.msra.mxu1 %v399_v54 }
  0x73   :  { %644 = vmatprep.subr.mxu0 %v382_v55  ;;  %682 = vmatprep.subr.mxu1 %v414_v56 }
  0x74   :  { %645 = vmatpush3.msra.mxu0 %v366_v57  ;;  %683 = vmatpush3.msra.mxu1 %v398_v58 }
  0x75   :  { %646 = vmatprep.subr.mxu0 %v381_v59  ;;  %684 = vmatprep.subr.mxu1 %v413_v60 }
  0x76   :  { %647 = vmatpush3.msra.mxu0 %v365_v61  ;;  %685 = vmatpush3.msra.mxu1 %v397_v62 }
  0x77   :  { %648 = vmatprep.subr.mxu0 %v380_v63  ;;  %686 = vmatprep.subr.mxu1 %v412_v1 }
  0x78   :  { %649 = vmatpush3.msra.mxu0 %v364_v2  ;;  %687 = vmatpush3.msra.mxu1 %v396_v3 }
 0x116   :  { %v234_v13 = vpop.f32.mrf.mxu0  ;;  %v311_v14 = vpop.f32.mrf.mxu1 }
 0x117   :  { %v235_v16 = vadd.f32 %v234_v13, %v151_v11  ;;  %v312_v17 = vadd.f32 %v311_v14, %v159_v12  ;;  %v617_v14 = vld [vmem:[%s903_s4] ss:$0 sm:$0xff] }
 0x118   :  { %v236_v18 = vpop.f32.mrf.mxu0  ;;  %v313_v19 = vpop.f32.mrf.mxu1 }
 0x119   :  { %v330_v20 = vmul.f32 0.70710677, %v235_v16  ;;  %v332_v21 = vmul.f32 0.70710677, %v312_v17  ;;  %v237_v22 = vadd.f32 %v236_v18, %v155_v15  ;;  %v314_v23 = vadd.f32 %v313_v19, %v163_v0 }
 0x11a   :  { %v240_v24 = vpop.f32.mrf.mxu0  ;;  %v317_v25 = vpop.f32.mrf.mxu1  ;;  %v322_v47 = vmul.f32 0.5, %v235_v16  ;;  %v324_v51 = vmul.f32 0.5, %v312_v17 }
 0x11b   :  { %704 = verf.f32 %v330_v20  ;;  %v241_v26 = vadd.f32 %v240_v24, %v151_v11  ;;  %v318_v27 = vadd.f32 %v317_v25, %v159_v12  ;;  %v331_v28 = vmul.f32 0.70710677, %v237_v22 }
 0x11c   :  { %706 = verf.f32 %v332_v21  ;;  %v242_v29 = vpop.f32.mrf.mxu0  ;;  %v319_v30 = vpop.f32.mrf.mxu1  ;;  %v333_v31 = vmul.f32 0.70710677, %v314_v23  ;;  %v323_v44 = vmul.f32 0.5, %v237_v22  ;;  %v325_v48 = vmul.f32 0.5, %v314_v23 }
 0x11d   :  { %v334_v32 = vmul.f32 0.70710677, %v241_v26  ;;  %708 = verf.f32 %v331_v28  ;;  %v336_v33 = vmul.f32 0.70710677, %v318_v27  ;;  %v243_v34 = vadd.f32 %v242_v29, %v155_v15 }
 0x11e   :  { %v320_v35 = vadd.f32 %v319_v30, %v163_v0  ;;  %710 = verf.f32 %v333_v31  ;;  %v326_v62 = vmul.f32 0.5, %v241_v26  ;;  %v328_v2 = vmul.f32 0.5, %v318_v27 }
 0x11f   :  { %712 = verf.f32 %v334_v32  ;;  %v335_v36 = vmul.f32 0.70710677, %v243_v34  ;;  %v327_v59 = vmul.f32 0.5, %v243_v34 }
 0x120   :  { %714 = verf.f32 %v336_v33  ;;  %v337_v37 = vmul.f32 0.70710677, %v320_v35  ;;  %v329_v63 = vmul.f32 0.5, %v320_v35 }
 0x121   :  { %716 = verf.f32 %v335_v36 }
 0x122   :  { %718 = verf.f32 %v337_v37 }
 0x128   :  { %v705_v38 = vpop.eup %704 }
 0x129   :  { %v707_v39 = vpop.eup %706  ;;  %v346_v41 = vadd.f32 1.0, %v705_v38 }
 0x12a   :  { %v709_v40 = vpop.eup %708  ;;  %v348_v43 = vadd.f32 1.0, %v707_v39 }
 0x12b   :  { %v711_v42 = vpop.eup %710  ;;  %v347_v45 = vadd.f32 1.0, %v709_v40  ;;  %v354_v54 = vmul.f32 %v346_v41, %v322_v47 }
 0x12c   :  { %v713_v46 = vpop.eup %712  ;;  %v349_v49 = vadd.f32 1.0, %v711_v42  ;;  %v356_v58 = vmul.f32 %v348_v43, %v324_v51 }
 0x12d   :  { %v715_v50 = vpop.eup %714  ;;  %v355_v52 = vmul.f32 %v347_v45, %v323_v44  ;;  %v350_v56 = vadd.f32 1.0, %v713_v46 }
 0x12e   :  { %v717_v53 = vpop.eup %716  ;;  %v357_v55 = vmul.f32 %v349_v49, %v325_v48  ;;  %v352_v61 = vadd.f32 1.0, %v715_v50 }
 0x12f   :  { %v719_v57 = vpop.eup %718  ;;  %492 = vmatprep.mubr.f32.mxu0 %v355_v52  ;;  %v351_v60 = vadd.f32 1.0, %v717_v53  ;;  %v358_v5 = vmul.f32 %v350_v56, %v326_v62 }
 0x130   :  { %567 = vmatprep.mubr.f32.mxu1 %v357_v55  ;;  %493 = vmatmul.mubr.f32.vlgmr.msra.gmra.mxu0 %v354_v54  ;;  %v353_v1 = vadd.f32 1.0, %v719_v57  ;;  %v360_v6 = vmul.f32 %v352_v61, %v328_v2 }
 0x131   :  { %568 = vmatmul.mubr.f32.vlgmr.msra.gmra.mxu1 %v356_v58  ;;  %v359_v3 = vmul.f32 %v351_v60, %v327_v59 }
 0x132   :  { %v361_v4 = vmul.f32 %v353_v1, %v329_v63 }
 0x133   :  { %497 = vmatprep.mubr.f32.mxu0 %v359_v3 }
 0x134   :  { %572 = vmatprep.mubr.f32.mxu1 %v361_v4  ;;  %498 = vmatmul.mubr.f32.gmra.mxu0 %v358_v5 }
 0x135   :  { %573 = vmatmul.mubr.f32.gmra.mxu1 %v360_v6 }
 0x1f0   :  { %v650_v7 = vpop.f32.mrf.mxu0 }
 0x1f1   :  { %v688_v8 = vpop.f32.mrf.mxu1 }
 0x1f2   :  { %v651_v9 = vpop.f32.mrf.mxu0 }
 0x1f3   :  { %v652_v10 = vadd.f32 %v651_v9, %v650_v7  ;;  %v689_v11 = vpop.f32.mrf.mxu1 }
 0x1f4   :  { %v690_v12 = vadd.f32 %v689_v11, %v688_v8  ;;  %v653_v13 = vpop.f32.mrf.mxu0 }
 0x1f5   :  { %v691_v15 = vpop.f32.mrf.mxu1 }
 0x1f6   :  { %v570_v0 = vadd.f32 %v690_v12, %v652_v10  ;;  %v654_v16 = vpop.f32.mrf.mxu0 }
 0x1f7   :  { %v655_v17 = vadd.f32 %v654_v16, %v653_v13  ;;  %v692_v18 = vpop.f32.mrf.mxu1 }
 0x1f8   :  { %v594_v19 = vadd.f32 %v617_v14, %v570_v0  ;;  %v693_v20 = vadd.f32 %v692_v18, %v691_v15 }
 0x1fa   :  { %596 = vst [vmem:[#allocation11] sm:$0xff] %v594_v19  ;;  %v575_v21 = vadd.f32 %v693_v20, %v655_v17 }
 0x1fc   :  { %v595_v22 = vadd.f32 %v617_v14, %v575_v21 }
 0x1fe   :  { %597 = vst [vmem:[#allocation11 + $0x8] sm:$0xff] %v595_v22 }
 0x1ff   :  { %811 = shalt.err (!%p808_p10)
}
 0x200   :  { %609 = dma.vmem_to_hbm [thread:$0]  %s604_s16, 256, %s904_s5, [#allocation5], %s832_s28, %s832_s28, %s833_s29  }
 0x201   :  { %826 = dma.done.wait [#allocation5], 256  }
 0x202   :  { %827 = vsyncadd [#allocation5], 4294967040 }
 0x203   :  { %613 = vsyncpa [#allocation4], 1 }
 0x204   :  { %614 = vsyncpa [#allocation7], 1 }
 0x205   :  { %615 = vsyncpa [#allocation10], 1 }
 0x206   :  { %616 = vsyncpa [#allocation5], 1 }

// kernel: _mlp_pallas_2d.1
= control target key start
LH: loop header
LB: loop body
LE: loop exit
PB: predicated region body
PF: predicated region fallthrough
CT: control target
= control target key end

     0   :  { %10 = vsyncpa [#allocation4], 0  ;;  %s899_s0 = inlined_call_operand.hbm [shape: f32[16,128], index: 0, kind: input, shape index: {}]   ;;  %s900_s1 = inlined_call_operand.hbm [shape: f32[128,512], index: 1, kind: input, shape index: {}]   ;;  %s901_s2 = inlined_call_operand.hbm [shape: f32[1,512], index: 2, kind: input, shape index: {}]   ;;  %s902_s3 = inlined_call_operand.hbm [shape: f32[512,128], index: 3, kind: input, shape index: {}]   ;;  %s903_s4 = inlined_call_operand.vmem [shape: f32[1,128], index: 4, kind: input, shape index: {}]   ;;  %s904_s5 = inlined_call_operand.hbm [shape: f32[16,128], index: 5, kind: output, shape index: {}]  }
   0x1   :  { %11 = vsyncpa [#allocation7], 0 }
   0x2   :  { %12 = vsyncpa [#allocation10], 0 }
   0x3   :  { %13 = vsyncpa [#allocation5], 0  ;;  %s828_s18 = smov [#allocation6]  }
   0x4   :  { %s31_s19 = sshll.u32 %s828_s18, 4  ;;  %s32_s19 = int_to_ptr.vmem [resolvable:$true] %s31_s19 }
   0x5   :  { %s728_s20 = scalar_lea.vmem %s32_s19, 8192  ;;  %p733_p1 = scmp.lt.s32.totalorder %s32_s19, %s32_s19 }
   0x6   :  { %p729_p0 = scmp.ne.s32.totalorder %s32_s19, %s728_s20  ;;  %p734_p2 = scmp.lt.s32.totalorder %s728_s20, %s728_s20 }
   0x8   :  { %p735_p3 = por %p734_p2, %p733_p1 }
   0xa   :  { %p736_p4 = pnand %p735_p3, %p729_p0 }
   0xc   :  { %739 = shalt.err (!%p736_p4)
}
   0xd   :  { %s829_s21 = smov 512   ;;  %s830_s22 = smov 32  }
   0xe   :  { %37 = dma.hbm_to_vmem [thread:$0]  %s900_s1, 8192, %s32_s19, [#allocation7], %s829_s21, %s829_s21, %s830_s22  }
   0xf   :  { %s831_s25 = smov [#allocation3]  }
  0x10   :  { %s19_s26 = sshll.u32 %s831_s25, 4  ;;  %s20_s26 = int_to_ptr.vmem [resolvable:$true] %s19_s26 }
  0x11   :  { %s748_s27 = scalar_lea.vmem %s20_s26, 256  ;;  %p753_p6 = scmp.lt.s32.totalorder %s20_s26, %s20_s26 }
  0x12   :  { %p749_p5 = scmp.ne.s32.totalorder %s20_s26, %s748_s27  ;;  %p754_p7 = scmp.lt.s32.totalorder %s748_s27, %s748_s27 }
  0x14   :  { %p755_p8 = por %p754_p7, %p753_p6 }
  0x16   :  { %p756_p9 = pnand %p755_p8, %p749_p5 }
  0x18   :  { %759 = shalt.err (!%p756_p9)
}
  0x19   :  { %s832_s28 = smov 128   ;;  %s833_s29 = smov 8  }
  0x1a   :  { %25 = dma.hbm_to_vmem [thread:$0]  %s899_s0, 256, %s20_s26, [#allocation4], %s832_s28, %s832_s28, %s833_s29  }
  0x1b   :  { %s834_s1 = smov [#allocation8]   ;;  %s835_s8 = smov [#allocation9]  }
  0x1c   :  { %s44_s7 = sshll.u32 %s834_s1, 4  ;;  %s53_s9 = sshll.u32 %s835_s8, 4  ;;  %s45_s7 = int_to_ptr.vmem [resolvable:$true] %s44_s7  ;;  %s54_s9 = int_to_ptr.vmem [resolvable:$true] %s53_s9 }
  0x1d   :  { %s768_s10 = scalar_lea.vmem %s45_s7, 64  ;;  %p773_p11 = scmp.lt.s32.totalorder %s45_s7, %s45_s7 }
  0x1e   :  { %p769_p10 = scmp.ne.s32.totalorder %s45_s7, %s768_s10  ;;  %p774_p12 = scmp.lt.s32.totalorder %s768_s10, %s768_s10 }
  0x20   :  { %p775_p13 = por %p774_p12, %p773_p11 }
  0x22   :  { %p776_p0 = pnand %p775_p13, %p769_p10 }
  0x24   :  { %779 = shalt.err (!%p776_p0)
}
  0x25   :  { %47 = dma.hbm_to_vmem [thread:$0]  %s901_s2, 64, %s45_s7, [#allocation7]  }
  0x26   :  { %s788_s13 = scalar_lea.vmem %s54_s9, 8192  ;;  %p793_p2 = scmp.lt.s32.totalorder %s54_s9, %s54_s9 }
  0x27   :  { %p789_p1 = scmp.ne.s32.totalorder %s54_s9, %s788_s13  ;;  %p794_p3 = scmp.lt.s32.totalorder %s788_s13, %s788_s13 }
  0x29   :  { %p795_p4 = por %p794_p3, %p793_p2 }
  0x2b   :  { %p796_p5 = pnand %p795_p4, %p789_p1 }
  0x2d   :  { %799 = shalt.err (!%p796_p5)
}
  0x2e   :  { %59 = dma.hbm_to_vmem [thread:$0]  %s902_s3, 8192, %s54_s9, [#allocation10], %s832_s28, %s832_s28, %s833_s29  }
  0x2f   :  { %820 = dma.done.wait [#allocation4], 256  }
  0x30   :  { %821 = vsyncadd [#allocation4], 4294967040 }
  0x31   :  { %822 = dma.done.wait [#allocation7], 8256  }
  0x32   :  { %823 = vsyncadd [#allocation7], 4294959040 }
  0x33   :  { %824 = dma.done.wait [#allocation10], 8192  }
  0x34   :  { %825 = vsyncadd [#allocation10], 4294959104  ;;  %v836_v0 = vmov 0.0   ;;  %v144_v1 = vld [vmem:[#allocation6 + $0x1e8] sm:$0xff]  ;;  %v146_v2 = vld [vmem:[#allocation6 + $0x1f8] sm:$0xff]  ;;  %s837_s15 = smov [#allocation11]  }
  0x35   :  { %232 = vmatprep.mubr.f32.mxu0 %v836_v0  ;;  %309 = vmatprep.mubr.f32.mxu1 %v836_v0  ;;  %v143_v3 = vld [vmem:[#allocation6 + $0x1e0] sm:$0xff]  ;;  %v145_v4 = vld [vmem:[#allocation6 + $0x1f0] sm:$0xff]  ;;  %v140_v5 = vld [vmem:[#allocation6 + $0x1c8] sm:$0xff]  ;;  %s603_s16 = sshll.u32 %s837_s15, 4  ;;  %s604_s16 = int_to_ptr.vmem [resolvable:$true] %s603_s16 }
  0x36   :  { %168 = vmatprep.subr.mxu0 %v144_v1  ;;  %245 = vmatprep.subr.mxu1 %v146_v2  ;;  %v142_v6 = vld [vmem:[#allocation6 + $0x1d8] sm:$0xff]  ;;  %v139_v7 = vld [vmem:[#allocation6 + $0x1c0] sm:$0xff]  ;;  %v141_v8 = vld [vmem:[#allocation6 + $0x1d0] sm:$0xff]  ;;  %s800_s17 = scalar_lea.vmem %s604_s16, 256  ;;  %p805_p7 = scmp.lt.s32.totalorder %s604_s16, %s604_s16 }
  0x37   :  { %169 = vmatpush1.msra.mxu0 %v143_v3  ;;  %246 = vmatpush1.msra.mxu1 %v145_v4  ;;  %v136_v9 = vld [vmem:[#allocation6 + $0x1a8] sm:$0xff]  ;;  %v138_v10 = vld [vmem:[#allocation6 + $0x1b8] sm:$0xff]  ;;  %v135_v11 = vld [vmem:[#allocation6 + $0x1a0] sm:$0xff]  ;;  %p801_p6 = scmp.ne.s32.totalorder %s604_s16, %s800_s17  ;;  %p806_p8 = scmp.lt.s32.totalorder %s800_s17, %s800_s17 }
  0x38   :  { %170 = vmatprep.subr.mxu0 %v140_v5  ;;  %247 = vmatprep.subr.mxu1 %v142_v6  ;;  %v137_v12 = vld [vmem:[#allocation6 + $0x1b0] sm:$0xff]  ;;  %v132_v13 = vld [vmem:[#allocation6 + $0x188] sm:$0xff]  ;;  %v134_v14 = vld [vmem:[#allocation6 + $0x198] sm:$0xff] }
  0x39   :  { %171 = vmatpush1.msra.mxu0 %v139_v7  ;;  %248 = vmatpush1.msra.mxu1 %v141_v8  ;;  %v131_v15 = vld [vmem:[#allocation6 + $0x180] sm:$0xff]  ;;  %v133_v16 = vld [vmem:[#allocation6 + $0x190] sm:$0xff]  ;;  %v128_v17 = vld [vmem:[#allocation6 + $0x168] sm:$0xff]  ;;  %p807_p9 = por %p806_p8, %p805_p7 }
  0x3a   :  { %172 = vmatprep.subr.mxu0 %v136_v9  ;;  %249 = vmatprep.subr.mxu1 %v138_v10  ;;  %v130_v18 = vld [vmem:[#allocation6 + $0x178] sm:$0xff]  ;;  %v127_v19 = vld [vmem:[#allocation6 + $0x160] sm:$0xff]  ;;  %v129_v20 = vld [vmem:[#allocation6 + $0x170] sm:$0xff] }
  0x3b   :  { %173 = vmatpush1.msra.mxu0 %v135_v11  ;;  %250 = vmatpush1.msra.mxu1 %v137_v12  ;;  %v124_v21 = vld [vmem:[#allocation6 + $0x148] sm:$0xff]  ;;  %v126_v22 = vld [vmem:[#allocation6 + $0x158] sm:$0xff]  ;;  %v123_v23 = vld [vmem:[#allocation6 + $0x140] sm:$0xff]  ;;  %p808_p10 = pnand %p807_p9, %p801_p6 }
  0x3c   :  { %174 = vmatprep.subr.mxu0 %v132_v13  ;;  %251 = vmatprep.subr.mxu1 %v134_v14  ;;  %v125_v24 = vld [vmem:[#allocation6 + $0x150] sm:$0xff]  ;;  %v120_v25 = vld [vmem:[#allocation6 + $0x128] sm:$0xff]  ;;  %v122_v26 = vld [vmem:[#allocation6 + $0x138] sm:$0xff] }
  0x3d   :  { %175 = vmatpush1.msra.mxu0 %v131_v15  ;;  %252 = vmatpush1.msra.mxu1 %v133_v16  ;;  %v119_v27 = vld [vmem:[#allocation6 + $0x120] sm:$0xff]  ;;  %v121_v28 = vld [vmem:[#allocation6 + $0x130] sm:$0xff]  ;;  %v116_v29 = vld [vmem:[#allocation6 + $0x108] sm:$0xff] }
  0x3e   :  { %176 = vmatprep.subr.mxu0 %v128_v17  ;;  %253 = vmatprep.subr.mxu1 %v130_v18  ;;  %v118_v30 = vld [vmem:[#allocation6 + $0x118] sm:$0xff]  ;;  %v115_v31 = vld [vmem:[#allocation6 + $0x100] sm:$0xff]  ;;  %v117_v32 = vld [vmem:[#allocation6 + $0x110] sm:$0xff] }
  0x3f   :  { %177 = vmatpush1.msra.mxu0 %v127_v19  ;;  %254 = vmatpush1.msra.mxu1 %v129_v20  ;;  %v112_v33 = vld [vmem:[#allocation6 + $0xe8] sm:$0xff]  ;;  %v114_v34 = vld [vmem:[#allocation6 + $0xf8] sm:$0xff]  ;;  %v111_v35 = vld [vmem:[#allocation6 + $0xe0] sm:$0xff] }
  0x40   :  { %178 = vmatprep.subr.mxu0 %v124_v21  ;;  %255 = vmatprep.subr.mxu1 %v126_v22  ;;  %v113_v36 = vld [vmem:[#allocation6 + $0xf0] sm:$0xff]  ;;  %v108_v37 = vld [vmem:[#allocation6 + $0xc8] sm:$0xff]  ;;  %v110_v38 = vld [vmem:[#allocation6 + $0xd8] sm:$0xff] }
  0x41   :  { %179 = vmatpush1.msra.mxu0 %v123_v23  ;;  %256 = vmatpush1.msra.mxu1 %v125_v24  ;;  %v107_v39 = vld [vmem:[#allocation6 + $0xc0] sm:$0xff]  ;;  %v109_v40 = vld [vmem:[#allocation6 + $0xd0] sm:$0xff]  ;;  %v104_v41 = vld [vmem:[#allocation6 + $0xa8] sm:$0xff] }
  0x42   :  { %180 = vmatprep.subr.mxu0 %v120_v25  ;;  %257 = vmatprep.subr.mxu1 %v122_v26  ;;  %v106_v42 = vld [vmem:[#allocation6 + $0xb8] sm:$0xff]  ;;  %v103_v43 = vld [vmem:[#allocation6 + $0xa0] sm:$0xff]  ;;  %v105_v44 = vld [vmem:[#allocation6 + $0xb0] sm:$0xff] }
  0x43   :  { %181 = vmatpush1.msra.mxu0 %v119_v27  ;;  %258 = vmatpush1.msra.mxu1 %v121_v28  ;;  %v100_v45 = vld [vmem:[#allocation6 + $0x88] sm:$0xff]  ;;  %v102_v46 = vld [vmem:[#allocation6 + $0x98] sm:$0xff]  ;;  %v99_v47 = vld [vmem:[#allocation6 + $0x80] sm:$0xff] }
  0x44   :  { %182 = vmatprep.subr.mxu0 %v116_v29  ;;  %259 = vmatprep.subr.mxu1 %v118_v30  ;;  %v101_v48 = vld [vmem:[#allocation6 + $0x90] sm:$0xff]  ;;  %v96_v49 = vld [vmem:[#allocation6 + $0x68] sm:$0xff]  ;;  %v98_v50 = vld [vmem:[#allocation6 + $0x78] sm:$0xff] }
  0x45   :  { %183 = vmatpush1.msra.mxu0 %v115_v31  ;;  %260 = vmatpush1.msra.mxu1 %v117_v32  ;;  %v95_v51 = vld [vmem:[#allocation6 + $0x60] sm:$0xff]  ;;  %v97_v52 = vld [vmem:[#allocation6 + $0x70] sm:$0xff]  ;;  %v92_v53 = vld [vmem:[#allocation6 + $0x48] sm:$0xff] }
  0x46   :  { %184 = vmatprep.subr.mxu0 %v112_v33  ;;  %261 = vmatprep.subr.mxu1 %v114_v34  ;;  %v94_v54 = vld [vmem:[#allocation6 + $0x58] sm:$0xff]  ;;  %v91_v55 = vld [vmem:[#allocation6 + $0x40] sm:$0xff]  ;;  %v93_v56 = vld [vmem:[#allocation6 + $0x50] sm:$0xff] }
  0x47   :  { %185 = vmatpush1.msra.mxu0 %v111_v35  ;;  %262 = vmatpush1.msra.mxu1 %v113_v36  ;;  %v88_v57 = vld [vmem:[#allocation6 + $0x28] sm:$0xff]  ;;  %v90_v58 = vld [vmem:[#allocation6 + $0x38] sm:$0xff]  ;;  %v87_v59 = vld [vmem:[#allocation6 + $0x20] sm:$0xff] }
  0x48   :  { %186 = vmatprep.subr.mxu0 %v108_v37  ;;  %263 = vmatprep.subr.mxu1 %v110_v38  ;;  %v89_v60 = vld [vmem:[#allocation6 + $0x30] sm:$0xff]  ;;  %v84_v61 = vld [vmem:[#allocation6 + $0x8] sm:$0xff]  ;;  %v86_v62 = vld [vmem:[#allocation6 + $0x18] sm:$0xff] }
  0x49   :  { %187 = vmatpush1.msra.mxu0 %v107_v39  ;;  %264 = vmatpush1.msra.mxu1 %v109_v40  ;;  %v83_v63 = vld [vmem:[#allocation6] sm:$0xff]  ;;  %v85_v1 = vld [vmem:[#allocation6 + $0x10] sm:$0xff]  ;;  %v82_v7 = vld [vmem:[#allocation3 + $0x8] sm:$0xff] }
  0x4a   :  { %188 = vmatprep.subr.mxu0 %v104_v41  ;;  %265 = vmatprep.subr.mxu1 %v106_v42  ;;  %v81_v2 = vld [vmem:[#allocation3] sm:$0xff]  ;;  %v395_v3 = vld [vmem:[#allocation9 + $0xf8] sm:$0xff]  ;;  %v424_v16 = vld [vmem:[#allocation9 + $0x1e0] sm:$0xff] }
  0x4b   :  { %189 = vmatpush1.msra.mxu0 %v103_v43  ;;  %266 = vmatpush1.msra.mxu1 %v105_v44  ;;  %v427_v4 = vld [vmem:[#allocation9 + $0x1f8] sm:$0xff]  ;;  %v394_v8 = vld [vmem:[#allocation9 + $0xf0] sm:$0xff]  ;;  %v393_v12 = vld [vmem:[#allocation9 + $0xe8] sm:$0xff] }
  0x4c   :  { %190 = vmatprep.subr.mxu0 %v100_v45  ;;  %267 = vmatprep.subr.mxu1 %v102_v46  ;;  %v379_v5 = vld [vmem:[#allocation9 + $0x78] sm:$0xff]  ;;  %v426_v9 = vld [vmem:[#allocation9 + $0x1f0] sm:$0xff]  ;;  %v425_v13 = vld [vmem:[#allocation9 + $0x1e8] sm:$0xff] }
  0x4d   :  { %191 = vmatpush1.msra.mxu0 %v99_v47  ;;  %268 = vmatpush1.msra.mxu1 %v101_v48  ;;  %v411_v6 = vld [vmem:[#allocation9 + $0x178] sm:$0xff]  ;;  %v378_v10 = vld [vmem:[#allocation9 + $0x70] sm:$0xff]  ;;  %v377_v14 = vld [vmem:[#allocation9 + $0x68] sm:$0xff] }
  0x4e   :  { %192 = vmatprep.subr.mxu0 %v96_v49  ;;  %269 = vmatprep.subr.mxu1 %v98_v50  ;;  %v410_v11 = vld [vmem:[#allocation9 + $0x170] sm:$0xff]  ;;  %v409_v15 = vld [vmem:[#allocation9 + $0x168] sm:$0xff]  ;;  %v376_v17 = vld [vmem:[#allocation9 + $0x60] sm:$0xff] }
  0x4f   :  { %193 = vmatpush1.msra.mxu0 %v95_v51  ;;  %270 = vmatpush1.msra.mxu1 %v97_v52  ;;  %v408_v18 = vld [vmem:[#allocation9 + $0x160] sm:$0xff]  ;;  %v391_v19 = vld [vmem:[#allocation9 + $0xd8] sm:$0xff]  ;;  %v390_v23 = vld [vmem:[#allocation9 + $0xd0] sm:$0xff] }
  0x50   :  { %194 = vmatprep.subr.mxu0 %v92_v53  ;;  %271 = vmatprep.subr.mxu1 %v94_v54  ;;  %v423_v20 = vld [vmem:[#allocation9 + $0x1d8] sm:$0xff]  ;;  %v422_v24 = vld [vmem:[#allocation9 + $0x1d0] sm:$0xff]  ;;  %v389_v27 = vld [vmem:[#allocation9 + $0xc8] sm:$0xff] }
  0x51   :  { %195 = vmatpush1.msra.mxu0 %v91_v55  ;;  %272 = vmatpush1.msra.mxu1 %v93_v56  ;;  %v375_v21 = vld [vmem:[#allocation9 + $0x58] sm:$0xff]  ;;  %v374_v25 = vld [vmem:[#allocation9 + $0x50] sm:$0xff]  ;;  %v421_v28 = vld [vmem:[#allocation9 + $0x1c8] sm:$0xff] }
  0x52   :  { %196 = vmatprep.subr.mxu0 %v88_v57  ;;  %273 = vmatprep.subr.mxu1 %v90_v58  ;;  %v407_v22 = vld [vmem:[#allocation9 + $0x158] sm:$0xff]  ;;  %v406_v26 = vld [vmem:[#allocation9 + $0x150] sm:$0xff]  ;;  %v373_v29 = vld [vmem:[#allocation9 + $0x48] sm:$0xff] }
  0x53   :  { %197 = vmatpush1.msra.mxu0 %v87_v59  ;;  %274 = vmatpush1.msra.mxu1 %v89_v60  ;;  %v405_v30 = vld [vmem:[#allocation9 + $0x148] sm:$0xff]  ;;  %v388_v31 = vld [vmem:[#allocation9 + $0xc0] sm:$0xff]  ;;  %v387_v35 = vld [vmem:[#allocation9 + $0xb8] sm:$0xff] }
  0x54   :  { %198 = vmatprep.subr.mxu0 %v84_v61  ;;  %275 = vmatprep.subr.mxu1 %v86_v62  ;;  %v420_v32 = vld [vmem:[#allocation9 + $0x1c0] sm:$0xff]  ;;  %v419_v36 = vld [vmem:[#allocation9 + $0x1b8] sm:$0xff]  ;;  %v386_v39 = vld [vmem:[#allocation9 + $0xb0] sm:$0xff] }
  0x55   :  { %199 = vmatpush1.msra.mxu0 %v83_v63  ;;  %276 = vmatpush1.msra.mxu1 %v85_v1  ;;  %v372_v33 = vld [vmem:[#allocation9 + $0x40] sm:$0xff]  ;;  %v371_v37 = vld [vmem:[#allocation9 + $0x38] sm:$0xff]  ;;  %v418_v40 = vld [vmem:[#allocation9 + $0x1b0] sm:$0xff] }
  0x56   :  { %233 = vmatmul.mubr.f32.vlgmr.msra.gmra.mxu0 %v81_v2  ;;  %310 = vmatmul.mubr.f32.vlgmr.msra.gmra.mxu1 %v81_v2  ;;  %v404_v34 = vld [vmem:[#allocation9 + $0x140] sm:$0xff]  ;;  %v403_v38 = vld [vmem:[#allocation9 + $0x138] sm:$0xff]  ;;  %v370_v41 = vld [vmem:[#allocation9 + $0x30] sm:$0xff] }
  0x57   :  { %238 = vmatprep.mubr.f32.mxu0 %v836_v0  ;;  %315 = vmatprep.mubr.f32.mxu1 %v836_v0  ;;  %v392_v0 = vld [vmem:[#allocation9 + $0xe0] sm:$0xff]  ;;  %v402_v42 = vld [vmem:[#allocation9 + $0x130] sm:$0xff]  ;;  %v385_v43 = vld [vmem:[#allocation9 + $0xa8] sm:$0xff] }
  0x58   :  { %618 = vmatprep.subr.mxu0 %v395_v3  ;;  %656 = vmatprep.subr.mxu1 %v427_v4  ;;  %v417_v44 = vld [vmem:[#allocation9 + $0x1a8] sm:$0xff]  ;;  %v384_v47 = vld [vmem:[#allocation9 + $0xa0] sm:$0xff]  ;;  %v383_v51 = vld [vmem:[#allocation9 + $0x98] sm:$0xff]  ;;  %v148_v4 = vlaneseq }
  0x59   :  { %619 = vmatpush3.msra.mxu0 %v379_v5  ;;  %657 = vmatpush3.msra.mxu1 %v411_v6  ;;  %v369_v45 = vld [vmem:[#allocation9 + $0x28] sm:$0xff]  ;;  %v416_v48 = vld [vmem:[#allocation9 + $0x1a0] sm:$0xff]  ;;  %v415_v52 = vld [vmem:[#allocation9 + $0x198] sm:$0xff] }
  0x5a   :  { %239 = vmatmul.mubr.f32.gmra.mxu0 %v82_v7  ;;  %316 = vmatmul.mubr.f32.gmra.mxu1 %v82_v7  ;;  %v401_v46 = vld [vmem:[#allocation9 + $0x128] sm:$0xff]  ;;  %v368_v49 = vld [vmem:[#allocation9 + $0x20] sm:$0xff]  ;;  %v367_v53 = vld [vmem:[#allocation9 + $0x18] sm:$0xff]  ;;  %v149_v5 = vshrl.u32 %v148_v4, 7 }
  0x5b   :  { %620 = vmatprep.subr.mxu0 %v394_v8  ;;  %658 = vmatprep.subr.mxu1 %v426_v9  ;;  %v400_v50 = vld [vmem:[#allocation9 + $0x120] sm:$0xff]  ;;  %v399_v54 = vld [vmem:[#allocation9 + $0x118] sm:$0xff]  ;;  %v382_v55 = vld [vmem:[#allocation9 + $0x90] sm:$0xff] }
  0x5c   :  { %621 = vmatpush3.msra.mxu0 %v378_v10  ;;  %659 = vmatpush3.msra.mxu1 %v410_v11  ;;  %v414_v56 = vld [vmem:[#allocation9 + $0x190] sm:$0xff]  ;;  %v381_v59 = vld [vmem:[#allocation9 + $0x88] sm:$0xff]  ;;  %v380_v63 = vld [vmem:[#allocation9 + $0x80] sm:$0xff]  ;;  %v150_v6 = vsub.s32 0, %v149_v5  ;;  %v158_v7 = vsub.s32 2, %v149_v5  ;;  %v154_v9 = vsub.s32 1, %v149_v5 }
  0x5d   :  { %622 = vmatprep.subr.mxu0 %v393_v12  ;;  %660 = vmatprep.subr.mxu1 %v425_v13  ;;  %v366_v57 = vld [vmem:[#allocation9 + $0x10] sm:$0xff]  ;;  %v413_v60 = vld [vmem:[#allocation9 + $0x188] sm:$0xff]  ;;  %v412_v1 = vld [vmem:[#allocation9 + $0x180] sm:$0xff]  ;;  %v162_v10 = vsub.s32 3, %v149_v5 }
  0x5e   :  { %623 = vmatpush3.msra.mxu0 %v377_v14  ;;  %661 = vmatpush3.msra.mxu1 %v409_v15  ;;  %v398_v58 = vld [vmem:[#allocation9 + $0x110] sm:$0xff]  ;;  %v365_v61 = vld [vmem:[#allocation9 + $0x8] sm:$0xff]  ;;  %v364_v2 = vld [vmem:[#allocation9] sm:$0xff] }
  0x5f   :  { %624 = vmatprep.subr.mxu0 %v392_v0  ;;  %662 = vmatprep.subr.mxu1 %v424_v16  ;;  %v397_v62 = vld [vmem:[#allocation9 + $0x108] sm:$0xff]  ;;  %v396_v3 = vld [vmem:[#allocation9 + $0x100] sm:$0xff]  ;;  %v80_v8 = vld [vmem:[#allocation8] sm:$0xf] }
  0x60   :  { %625 = vmatpush3.msra.mxu0 %v376_v17  ;;  %663 = vmatpush3.msra.mxu1 %v408_v18  ;;  %v151_v11 = vrot.slane %v80_v8, %v150_v6  ;;  %v159_v12 = vrot.slane %v80_v8, %v158_v7  ;;  %v155_v15 = vrot.slane %v80_v8, %v154_v9 }
  0x61   :  { %626 = vmatprep.subr.mxu0 %v391_v19  ;;  %664 = vmatprep.subr.mxu1 %v423_v20  ;;  %v163_v0 = vrot.slane %v80_v8, %v162_v10 }
  0x62   :  { %627 = vmatpush3.msra.mxu0 %v375_v21  ;;  %665 = vmatpush3.msra.mxu1 %v407_v22 }
  0x63   :  { %628 = vmatprep.subr.mxu0 %v390_v23  ;;  %666 = vmatprep.subr.mxu1 %v422_v24 }
  0x64   :  { %629 = vmatpush3.msra.mxu0 %v374_v25  ;;  %667 = vmatpush3.msra.mxu1 %v406_v26 }
  0x65   :  { %630 = vmatprep.subr.mxu0 %v389_v27  ;;  %668 = vmatprep.subr.mxu1 %v421_v28 }
  0x66   :  { %631 = vmatpush3.msra.mxu0 %v373_v29  ;;  %669 = vmatpush3.msra.mxu1 %v405_v30 }
  0x67   :  { %632 = vmatprep.subr.mxu0 %v388_v31  ;;  %670 = vmatprep.subr.mxu1 %v420_v32 }
  0x68   :  { %633 = vmatpush3.msra.mxu0 %v372_v33  ;;  %671 = vmatpush3.msra.mxu1 %v404_v34 }
  0x69   :  { %634 = vmatprep.subr.mxu0 %v387_v35  ;;  %672 = vmatprep.subr.mxu1 %v419_v36 }
  0x6a   :  { %635 = vmatpush3.msra.mxu0 %v371_v37  ;;  %673 = vmatpush3.msra.mxu1 %v403_v38 }
  0x6b   :  { %636 = vmatprep.subr.mxu0 %v386_v39  ;;  %674 = vmatprep.subr.mxu1 %v418_v40 }
  0x6c   :  { %637 = vmatpush3.msra.mxu0 %v370_v41  ;;  %675 = vmatpush3.msra.mxu1 %v402_v42 }
  0x6d   :  { %638 = vmatprep.subr.mxu0 %v385_v43  ;;  %676 = vmatprep.subr.mxu1 %v417_v44 }
  0x6e   :  { %639 = vmatpush3.msra.mxu0 %v369_v45  ;;  %677 = vmatpush3.msra.mxu1 %v401_v46 }
  0x6f   :  { %640 = vmatprep.subr.mxu0 %v384_v47  ;;  %678 = vmatprep.subr.mxu1 %v416_v48 }
  0x70   :  { %641 = vmatpush3.msra.mxu0 %v368_v49  ;;  %679 = vmatpush3.msra.mxu1 %v400_v50 }
  0x71   :  { %642 = vmatprep.subr.mxu0 %v383_v51  ;;  %680 = vmatprep.subr.mxu1 %v415_v52 }
  0x72   :  { %643 = vmatpush3.msra.mxu0 %v367_v53  ;;  %681 = vmatpush3.msra.mxu1 %v399_v54 }
  0x73   :  { %644 = vmatprep.subr.mxu0 %v382_v55  ;;  %682 = vmatprep.subr.mxu1 %v414_v56 }
  0x74   :  { %645 = vmatpush3.msra.mxu0 %v366_v57  ;;  %683 = vmatpush3.msra.mxu1 %v398_v58 }
  0x75   :  { %646 = vmatprep.subr.mxu0 %v381_v59  ;;  %684 = vmatprep.subr.mxu1 %v413_v60 }
  0x76   :  { %647 = vmatpush3.msra.mxu0 %v365_v61  ;;  %685 = vmatpush3.msra.mxu1 %v397_v62 }
  0x77   :  { %648 = vmatprep.subr.mxu0 %v380_v63  ;;  %686 = vmatprep.subr.mxu1 %v412_v1 }
  0x78   :  { %649 = vmatpush3.msra.mxu0 %v364_v2  ;;  %687 = vmatpush3.msra.mxu1 %v396_v3 }
 0x116   :  { %v234_v13 = vpop.f32.mrf.mxu0  ;;  %v311_v14 = vpop.f32.mrf.mxu1 }
 0x117   :  { %v235_v16 = vadd.f32 %v234_v13, %v151_v11  ;;  %v312_v17 = vadd.f32 %v311_v14, %v159_v12  ;;  %v617_v14 = vld [vmem:[%s903_s4] ss:$0 sm:$0xff] }
 0x118   :  { %v236_v18 = vpop.f32.mrf.mxu0  ;;  %v313_v19 = vpop.f32.mrf.mxu1 }
 0x119   :  { %v330_v20 = vmul.f32 0.70710677, %v235_v16  ;;  %v332_v21 = vmul.f32 0.70710677, %v312_v17  ;;  %v237_v22 = vadd.f32 %v236_v18, %v155_v15  ;;  %v314_v23 = vadd.f32 %v313_v19, %v163_v0 }
 0x11a   :  { %v240_v24 = vpop.f32.mrf.mxu0  ;;  %v317_v25 = vpop.f32.mrf.mxu1  ;;  %v322_v47 = vmul.f32 0.5, %v235_v16  ;;  %v324_v51 = vmul.f32 0.5, %v312_v17 }
 0x11b   :  { %704 = verf.f32 %v330_v20  ;;  %v241_v26 = vadd.f32 %v240_v24, %v151_v11  ;;  %v318_v27 = vadd.f32 %v317_v25, %v159_v12  ;;  %v331_v28 = vmul.f32 0.70710677, %v237_v22 }
 0x11c   :  { %706 = verf.f32 %v332_v21  ;;  %v242_v29 = vpop.f32.mrf.mxu0  ;;  %v319_v30 = vpop.f32.mrf.mxu1  ;;  %v333_v31 = vmul.f32 0.70710677, %v314_v23  ;;  %v323_v44 = vmul.f32 0.5, %v237_v22  ;;  %v325_v48 = vmul.f32 0.5, %v314_v23 }
 0x11d   :  { %v334_v32 = vmul.f32 0.70710677, %v241_v26  ;;  %708 = verf.f32 %v331_v28  ;;  %v336_v33 = vmul.f32 0.70710677, %v318_v27  ;;  %v243_v34 = vadd.f32 %v242_v29, %v155_v15 }
 0x11e   :  { %v320_v35 = vadd.f32 %v319_v30, %v163_v0  ;;  %710 = verf.f32 %v333_v31  ;;  %v326_v62 = vmul.f32 0.5, %v241_v26  ;;  %v328_v2 = vmul.f32 0.5, %v318_v27 }
 0x11f   :  { %712 = verf.f32 %v334_v32  ;;  %v335_v36 = vmul.f32 0.70710677, %v243_v34  ;;  %v327_v59 = vmul.f32 0.5, %v243_v34 }
 0x120   :  { %714 = verf.f32 %v336_v33  ;;  %v337_v37 = vmul.f32 0.70710677, %v320_v35  ;;  %v329_v63 = vmul.f32 0.5, %v320_v35 }
 0x121   :  { %716 = verf.f32 %v335_v36 }
 0x122   :  { %718 = verf.f32 %v337_v37 }
 0x128   :  { %v705_v38 = vpop.eup %704 }
 0x129   :  { %v707_v39 = vpop.eup %706  ;;  %v346_v41 = vadd.f32 1.0, %v705_v38 }
 0x12a   :  { %v709_v40 = vpop.eup %708  ;;  %v348_v43 = vadd.f32 1.0, %v707_v39 }
 0x12b   :  { %v711_v42 = vpop.eup %710  ;;  %v347_v45 = vadd.f32 1.0, %v709_v40  ;;  %v354_v54 = vmul.f32 %v346_v41, %v322_v47 }
 0x12c   :  { %v713_v46 = vpop.eup %712  ;;  %v349_v49 = vadd.f32 1.0, %v711_v42  ;;  %v356_v58 = vmul.f32 %v348_v43, %v324_v51 }
 0x12d   :  { %v715_v50 = vpop.eup %714  ;;  %v355_v52 = vmul.f32 %v347_v45, %v323_v44  ;;  %v350_v56 = vadd.f32 1.0, %v713_v46 }
 0x12e   :  { %v717_v53 = vpop.eup %716  ;;  %v357_v55 = vmul.f32 %v349_v49, %v325_v48  ;;  %v352_v61 = vadd.f32 1.0, %v715_v50 }
 0x12f   :  { %v719_v57 = vpop.eup %718  ;;  %492 = vmatprep.mubr.f32.mxu0 %v355_v52  ;;  %v351_v60 = vadd.f32 1.0, %v717_v53  ;;  %v358_v5 = vmul.f32 %v350_v56, %v326_v62 }
 0x130   :  { %567 = vmatprep.mubr.f32.mxu1 %v357_v55  ;;  %493 = vmatmul.mubr.f32.vlgmr.msra.gmra.mxu0 %v354_v54  ;;  %v353_v1 = vadd.f32 1.0, %v719_v57  ;;  %v360_v6 = vmul.f32 %v352_v61, %v328_v2 }
 0x131   :  { %568 = vmatmul.mubr.f32.vlgmr.msra.gmra.mxu1 %v356_v58  ;;  %v359_v3 = vmul.f32 %v351_v60, %v327_v59 }
 0x132   :  { %v361_v4 = vmul.f32 %v353_v1, %v329_v63 }
 0x133   :  { %497 = vmatprep.mubr.f32.mxu0 %v359_v3 }
 0x134   :  { %572 = vmatprep.mubr.f32.mxu1 %v361_v4  ;;  %498 = vmatmul.mubr.f32.gmra.mxu0 %v358_v5 }
 0x135   :  { %573 = vmatmul.mubr.f32.gmra.mxu1 %v360_v6 }
 0x1f0   :  { %v650_v7 = vpop.f32.mrf.mxu0 }
 0x1f1   :  { %v688_v8 = vpop.f32.mrf.mxu1 }
 0x1f2   :  { %v651_v9 = vpop.f32.mrf.mxu0 }
 0x1f3   :  { %v652_v10 = vadd.f32 %v651_v9, %v650_v7  ;;  %v689_v11 = vpop.f32.mrf.mxu1 }
 0x1f4   :  { %v690_v12 = vadd.f32 %v689_v11, %v688_v8  ;;  %v653_v13 = vpop.f32.mrf.mxu0 }
 0x1f5   :  { %v691_v15 = vpop.f32.mrf.mxu1 }
 0x1f6   :  { %v570_v0 = vadd.f32 %v690_v12, %v652_v10  ;;  %v654_v16 = vpop.f32.mrf.mxu0 }
 0x1f7   :  { %v655_v17 = vadd.f32 %v654_v16, %v653_v13  ;;  %v692_v18 = vpop.f32.mrf.mxu1 }
 0x1f8   :  { %v594_v19 = vadd.f32 %v617_v14, %v570_v0  ;;  %v693_v20 = vadd.f32 %v692_v18, %v691_v15 }
 0x1fa   :  { %596 = vst [vmem:[#allocation11] sm:$0xff] %v594_v19  ;;  %v575_v21 = vadd.f32 %v693_v20, %v655_v17 }
 0x1fc   :  { %v595_v22 = vadd.f32 %v617_v14, %v575_v21 }
 0x1fe   :  { %597 = vst [vmem:[#allocation11 + $0x8] sm:$0xff] %v595_v22 }
 0x1ff   :  { %811 = shalt.err (!%p808_p10)
}
 0x200   :  { %609 = dma.vmem_to_hbm [thread:$0]  %s604_s16, 256, %s904_s5, [#allocation5], %s832_s28, %s832_s28, %s833_s29  }
 0x201   :  { %826 = dma.done.wait [#allocation5], 256  }
 0x202   :  { %827 = vsyncadd [#allocation5], 4294967040 }
 0x203   :  { %613 = vsyncpa [#allocation4], 1 }
 0x204   :  { %614 = vsyncpa [#allocation7], 1 }
 0x205   :  { %615 = vsyncpa [#allocation10], 1 }
 0x206   :  { %616 = vsyncpa [#allocation5], 1 }

</bundles_post_ra>
